<compile_context>
chip_gen: v5e
topology: v5e:2x2
jax: 0.10.0
libtpu: 0.0.40
codegen_flags: <defaults>
</compile_context>

<pallas_src>
import functools

import jax
import jax.numpy as jnp
from jax.experimental import pallas as pl
from jax.experimental.pallas import tpu as pltpu

# ---------------- config (mirrors cfg in the PyTorch module) ----------------
IMG_W, IMG_H = 64, 64          # cfg.img_size
I3D_NCH = 4                    # cfg.autoencoder.i3d.nch   (C)
I3D_SEQ_LEN = 3                # cfg.autoencoder.i3d.seq_len (T)
FY, FX = 16, 16                # feature-map spatial size of z_vis
N_CLUSTERS = 4                 # cfg.clustering.n_clusters
T_ALPHA = 1.0                  # cfg.clustering.alpha
ROI_OUT = 4                    # cfg.clustering.roialign.output_size
ROI_SCALE = 1.0                # cfg.clustering.roialign.spatial_scale
ROI_ALIGNED = True             # cfg.clustering.roialign.aligned
NDF = 32                       # cfg.clustering.ndf
ADD_SPC_FEATURE = True
BN, SN = 2, 8                  # batch size, samples (boxes) per batch
BINS = ROI_OUT * ROI_OUT
DIN = I3D_NCH * BINS


# ------------------------------ fused Pallas kernel --------------------------
def _fused_kernel(zvis_ref, wbil_ref, norms_ref, mask_ref,
                  wvis_ref, bvis_ref, wspc_ref, bspc_ref,
                  centt_ref, csq_ref,
                  zall_ref, s_ref, x_scr,
                  *, bn, sn, nch, t_len, bins, alpha, exponent, add_spc):
    # (A) temporal mean pool == AvgPool3d((T,1,1)) : (T, bn*C, HW) -> (bn*C, HW)
    feat = zvis_ref[0]
    for t in range(1, t_len):
        feat = feat + zvis_ref[t]
    feat = feat * (1.0 / float(t_len))

    # (B) RoIAlign as a dense bilinear-weight contraction, written straight into
    #     the (roi, c*bins) layout emb_visual expects (no reshape/transpose of a
    #     matmul result needed).  Per (batch, channel): (sn, bins, HW) * (1, HW)
    #     -> lane reduce -> (sn, bins) block store into scratch.
    for b in range(bn):
        w3 = wbil_ref[b]                                     # (sn, bins, HW)
        for c in range(nch):
            row = b * nch + c
            f = feat[row:row + 1, :]                         # (1, HW)
            p = jnp.sum(w3 * f, axis=-1)                     # (sn, bins)
            x_scr[b * sn:(b + 1) * sn, c * bins:(c + 1) * bins] = p

    # (C) emb_visual on the MXU.  The PyTorch `z_vis * 4` scale is pre-folded
    #     into wvis/bvis outside the kernel.
    z = jnp.dot(x_scr[...], wvis_ref[...],
                preferred_element_type=jnp.float32) + bvis_ref[...]      # (R, ndf)
    if add_spc:
        # emb_spacial = Linear(1, ndf): norms (R,1) * W^T (1,ndf) + b
        z = z + norms_ref[...] * wspc_ref[...] + bspc_ref[...]
    valid = mask_ref[...] > 0.5                                          # (R, 1)
    z = jnp.where(valid, z, 0.0)        # NaN-safe: invalid rows stay exactly 0

    # (D) Student-t soft assignment with UNsquared L2 distance (matches torch
    #     vector_norm):  dist = sqrt(||z||^2 + ||c||^2 - 2 z c^T)
    zsq = jnp.sum(z * z, axis=-1, keepdims=True)                         # (R, 1)
    cross = jnp.dot(z, centt_ref[...], preferred_element_type=jnp.float32)  # (R, K)
    sq = jnp.maximum(zsq + csq_ref[...] - 2.0 * cross, 0.0)
    dist = jnp.sqrt(sq)
    base = 1.0 + dist * (1.0 / alpha)
    if abs(exponent - 1.0) < 1e-12:
        s_tmp = pl.reciprocal(base)            # exact; alpha == 1 specialization
    else:
        s_tmp = jnp.exp(-exponent * jnp.log(base))   # base >= 1, exact semantics
    s = s_tmp * pl.reciprocal(jnp.sum(s_tmp, axis=-1, keepdims=True))

    zall_ref[...] = z
    s_ref[...] = jnp.where(valid, s, 0.0)      # rows for NaN boxes stay exactly 0


# ---------------- dense RoIAlign bilinear weights (plain JAX, no gathers) ----
def _bilinear_weight_matrix(boxes, valid, fy, fx, out_size, spatial_scale, aligned):
    """W[b, s, bin, hw] such that pooled[b, s, c, bin] = sum_hw W * feat[b, c, hw].

    boxes: (bn, sn, 4) [x1,y1,x2,y2] already in feature-map coords, NaNs removed.
    valid: (bn, sn) bool; weight rows of invalid boxes are zeroed.
    Implements torchvision RoIAlign semantics with sampling_ratio=1.
    """
    bn, sn = boxes.shape[:2]
    offset = 0.5 if aligned else 0.0
    x1 = boxes[..., 0] * spatial_scale - offset
    y1 = boxes[..., 1] * spatial_scale - offset
    x2 = boxes[..., 2] * spatial_scale - offset
    y2 = boxes[..., 3] * spatial_scale - offset
    rw, rh = x2 - x1, y2 - y1
    if not aligned:
        rw = jnp.maximum(rw, 1.0)
        rh = jnp.maximum(rh, 1.0)
    bw = rw / out_size
    bh = rh / out_size
    centers = jnp.arange(out_size, dtype=jnp.float32) + 0.5
    xs = x1[..., None] + centers * bw[..., None]            # (bn, sn, os)
    ys = y1[..., None] + centers * bh[..., None]            # (bn, sn, os)
    yy = jnp.broadcast_to(ys[..., :, None], (bn, sn, out_size, out_size))
    xx = jnp.broadcast_to(xs[..., None, :], (bn, sn, out_size, out_size))

    def corner(v, size):
        inb = (v >= -1.0) & (v <= float(size))
        vc = jnp.maximum(v, 0.0)
        low = jnp.floor(vc)
        hi_clamp = low >= size - 1
        low = jnp.where(hi_clamp, float(size - 1), low)
        high = jnp.where(hi_clamp, float(size - 1), low + 1.0)
        vc = jnp.where(hi_clamp, float(size - 1), vc)
        frac = vc - low
        return low.astype(jnp.int32), high.astype(jnp.int32), frac, inb

    y_lo, y_hi, ly, y_in = corner(yy, fy)
    x_lo, x_hi, lx, x_in = corner(xx, fx)
    hy, hx = 1.0 - ly, 1.0 - lx
    inb = ((y_in & x_in).astype(jnp.float32)
           * valid[..., None, None].astype(jnp.float32))

    iy = jnp.arange(fy, dtype=jnp.int32)
    ix = jnp.arange(fx, dtype=jnp.int32)

    def scatter(w, yi, xi):
        oy = (yi[..., None] == iy).astype(jnp.float32)      # (bn,sn,os,os,fy)
        ox = (xi[..., None] == ix).astype(jnp.float32)      # (bn,sn,os,os,fx)
        return (w * inb)[..., None, None] * oy[..., :, None] * ox[..., None, :]

    w = (scatter(hy * hx, y_lo, x_lo) + scatter(hy * lx, y_lo, x_hi)
         + scatter(ly * hx, y_hi, x_lo) + scatter(ly * lx, y_hi, x_hi))
    return w.reshape(bn, sn, out_size * out_size, fy * fx)


# ------------------------------- forward pass ---------------------------------
def clustering_forward(z_vis, bboxs, norms, params):
    bn, nch, t_len, fy, fx = z_vis.shape
    sn = bboxs.shape[1]
    r = bn * sn

    # Valid (non-NaN bbox) samples are compacted to the front of each batch,
    # matching the PyTorch per-batch boolean-mask compaction (stable order).
    mask = ~jnp.isnan(bboxs).any(axis=-1)                              # (bn, sn)
    perm = jnp.argsort(~mask, axis=1, stable=True)
    bbox_s = jnp.take_along_axis(bboxs, perm[:, :, None], axis=1)
    # TODO(synk): the original torch code reassigns `norms` inside the batch loop
    # (a bug for bn > 1); we implement the intended per-batch semantics.
    norms_s = jnp.take_along_axis(norms.reshape(bn, sn, 1), perm[:, :, None], axis=1)
    mask_s = jnp.take_along_axis(mask, perm, axis=1)

    # bbox scaling to feature coords + nan_to_num(0) (as in the torch roi glue)
    scale = jnp.array([fx / IMG_W, fy / IMG_H, fx / IMG_W, fy / IMG_H], jnp.float32)
    boxes = jnp.nan_to_num(bbox_s * scale, nan=0.0)

    # Dense RoIAlign weights: pure broadcast arithmetic, no scalar gathers.
    w_bilin = _bilinear_weight_matrix(boxes, mask_s, fy, fx,
                                      ROI_OUT, ROI_SCALE, ROI_ALIGNED)

    # z_vis arranged so the temporal axis leads and (b, c) rows sit on sublanes.
    zv = jnp.transpose(z_vis, (2, 0, 1, 3, 4)).reshape(t_len, bn * nch, fy * fx)

    norms_f = norms_s.reshape(r, 1).astype(jnp.float32)
    mask_f = mask_s.reshape(r, 1).astype(jnp.float32)

    kernel = functools.partial(
        _fused_kernel, bn=bn, sn=sn, nch=nch, t_len=t_len, bins=BINS,
        alpha=T_ALPHA, exponent=(T_ALPHA + 1.0) / 2.0, add_spc=ADD_SPC_FEATURE)

    z_flat, s_flat = pl.pallas_call(
        kernel,
        out_shape=(jax.ShapeDtypeStruct((r, NDF), jnp.float32),
                   jax.ShapeDtypeStruct((r, N_CLUSTERS), jnp.float32)),
        grid=(1,),
        in_specs=[
            pl.BlockSpec((t_len, bn * nch, fy * fx), lambda i: (0, 0, 0)),
            pl.BlockSpec((bn, sn, BINS, fy * fx), lambda i: (0, 0, 0, 0)),
            pl.BlockSpec((r, 1), lambda i: (0, 0)),
            pl.BlockSpec((r, 1), lambda i: (0, 0)),
            pl.BlockSpec((DIN, NDF), lambda i: (0, 0)),
            pl.BlockSpec((1, NDF), lambda i: (0, 0)),
            pl.BlockSpec((1, NDF), lambda i: (0, 0)),
            pl.BlockSpec((1, NDF), lambda i: (0, 0)),
            pl.BlockSpec((NDF, N_CLUSTERS), lambda i: (0, 0)),
            pl.BlockSpec((1, N_CLUSTERS), lambda i: (0, 0)),
        ],
        out_specs=(pl.BlockSpec((r, NDF), lambda i: (0, 0)),
                   pl.BlockSpec((r, N_CLUSTERS), lambda i: (0, 0))),
        scratch_shapes=[pltpu.VMEM((r, DIN), jnp.float32)],
    )(zv, w_bilin, norms_f, mask_f,
      params["w_vis_fold"], params["b_vis_fold"],
      params["w_spc"], params["b_spc"],
      params["cent_t"], params["cent_sq"])

    z_all = z_flat.reshape(bn, sn, NDF)
    s = s_flat.reshape(bn, sn, N_CLUSTERS)
    c = jnp.argmax(s, axis=2)
    return z_all, s, c


# --------------------------- deterministic parameters --------------------------
def init_params(key):
    ks = jax.random.split(key, 6)
    w_vis = jax.random.normal(ks[0], (DIN, NDF), jnp.float32) * 0.1   # emb_visual W^T
    b_vis = jax.random.normal(ks[1], (1, NDF), jnp.float32) * 0.1
    w_spc = jax.random.normal(ks[2], (1, NDF), jnp.float32) * 0.1     # emb_spacial W^T
    b_spc = jax.random.normal(ks[3], (1, NDF), jnp.float32) * 0.1
    # centroids = emb_visual(randn(K, Din)) + emb_spacial(rand(K, 1)) (unscaled,
    # exactly as in __init__)
    z_vis0 = jax.random.normal(ks[4], (N_CLUSTERS, DIN), jnp.float32)
    z_spc0 = jax.random.uniform(ks[5], (N_CLUSTERS, 1), jnp.float32)
    centroids = (z_vis0 @ w_vis + b_vis) + (z_spc0 @ w_spc + b_spc)   # (K, ndf)
    # Fold the forward-time `z_vis * 4` scale into the emb_visual parameters.
    vis_scale = 4.0 if ADD_SPC_FEATURE else 1.0
    # TODO(synk): _attn_vis_spc / _attn_spc_vis MultiheadAttention are defined in
    # __init__ but never used in forward(), so they are omitted here.
    return dict(
        w_vis_fold=w_vis * vis_scale,
        b_vis_fold=b_vis * vis_scale,
        w_spc=w_spc, b_spc=b_spc,
        cent_t=centroids.T,                                       # (ndf, K)
        cent_sq=jnp.sum(centroids * centroids, axis=1)[None, :],  # (1, K)
    )


if __name__ == "__main__":
    key = jax.random.PRNGKey(0)
    kp, k1, k2, k3, k4 = jax.random.split(key, 5)
    params = init_params(kp)

    z_vis = jax.random.normal(k1, (BN, I3D_NCH, I3D_SEQ_LEN, FY, FX), jnp.float32)
    xy = jax.random.uniform(k2, (BN, SN, 2), jnp.float32) * (IMG_W - 12.0)
    wh = jax.random.uniform(k3, (BN, SN, 2), jnp.float32) * 8.0 + 2.0
    bboxs = jnp.concatenate([xy, xy + wh], axis=-1)        # (bn, sn, 4) x1,y1,x2,y2
    # a few NaN (missing) detections, as the torch forward expects
    bboxs = bboxs.at[0, 6:].set(jnp.nan)
    bboxs = bboxs.at[1, 7:].set(jnp.nan)
    norms = jax.random.uniform(k4, (BN, SN, 1), jnp.float32)

    fwd = jax.jit(clustering_forward)
    z_all, s, c = fwd(z_vis, bboxs, norms, params)
    jax.block_until_ready((z_all, s, c))
    assert z_all.shape == (BN, SN, NDF)
    assert s.shape == (BN, SN, N_CLUSTERS)
    assert c.shape == (BN, SN)
    assert bool(jnp.isfinite(z_all).all()) and bool(jnp.isfinite(s).all())
    print("KERNEL_OK")
</pallas_src>

<mosaic_0001>
module attributes {stable_mosaic.version = 11 : i64} {
  func.func @_fused_kernel(%arg0: i32, %arg1: memref<3x8x256xf32, #tpu.memory_space<vmem>>, %arg2: memref<2x8x16x256xf32, #tpu.memory_space<vmem>>, %arg3: memref<16x1xf32, #tpu.memory_space<vmem>>, %arg4: memref<16x1xf32, #tpu.memory_space<vmem>>, %arg5: memref<64x32xf32, #tpu.memory_space<vmem>>, %arg6: memref<1x32xf32, #tpu.memory_space<vmem>>, %arg7: memref<1x32xf32, #tpu.memory_space<vmem>>, %arg8: memref<1x32xf32, #tpu.memory_space<vmem>>, %arg9: memref<32x4xf32, #tpu.memory_space<vmem>>, %arg10: memref<1x4xf32, #tpu.memory_space<vmem>>, %arg11: memref<16x32xf32, #tpu.memory_space<vmem>>, %arg12: memref<16x4xf32, #tpu.memory_space<vmem>>, %arg13: memref<16x64xf32, #tpu.memory_space<vmem>>) attributes {dimension_semantics = [#tpu.dimension_semantics<arbitrary>], iteration_bounds = array<i64: 1>, scalar_prefetch = 0 : i64, scratch_operands = 1 : i64, tpu.core_type = #tpu.core_type<tc>, window_params = [{pipeline_mode = #tpu.pipeline_mode<synchronous>, transform_indices = @transform_0, window_bounds = array<i64: 3, 8, 256>}, {pipeline_mode = #tpu.pipeline_mode<synchronous>, transform_indices = @transform_1, window_bounds = array<i64: 2, 8, 16, 256>}, {pipeline_mode = #tpu.pipeline_mode<synchronous>, transform_indices = @transform_2, window_bounds = array<i64: 16, 1>}, {pipeline_mode = #tpu.pipeline_mode<synchronous>, transform_indices = @transform_3, window_bounds = array<i64: 16, 1>}, {pipeline_mode = #tpu.pipeline_mode<synchronous>, transform_indices = @transform_4, window_bounds = array<i64: 64, 32>}, {pipeline_mode = #tpu.pipeline_mode<synchronous>, transform_indices = @transform_5, window_bounds = array<i64: 1, 32>}, {pipeline_mode = #tpu.pipeline_mode<synchronous>, transform_indices = @transform_6, window_bounds = array<i64: 1, 32>}, {pipeline_mode = #tpu.pipeline_mode<synchronous>, transform_indices = @transform_7, window_bounds = array<i64: 1, 32>}, {pipeline_mode = #tpu.pipeline_mode<synchronous>, transform_indices = @transform_8, window_bounds = array<i64: 32, 4>}, {pipeline_mode = #tpu.pipeline_mode<synchronous>, transform_indices = @transform_9, window_bounds = array<i64: 1, 4>}, {pipeline_mode = #tpu.pipeline_mode<synchronous>, transform_indices = @transform_10, window_bounds = array<i64: 16, 32>}, {pipeline_mode = #tpu.pipeline_mode<synchronous>, transform_indices = @transform_11, window_bounds = array<i64: 16, 4>}]} {
    %c0 = arith.constant 0 : index
    %c0_0 = arith.constant 0 : index
    %c0_1 = arith.constant 0 : index
    %0 = vector.load %arg1[%c0, %c0_0, %c0_1] : memref<3x8x256xf32, #tpu.memory_space<vmem>>, vector<1x8x256xf32>
    %1 = vector.shape_cast %0 : vector<1x8x256xf32> to vector<8x256xf32>
    %c1 = arith.constant 1 : index
    %c0_2 = arith.constant 0 : index
    %c0_3 = arith.constant 0 : index
    %2 = vector.load %arg1[%c1, %c0_2, %c0_3] : memref<3x8x256xf32, #tpu.memory_space<vmem>>, vector<1x8x256xf32>
    %3 = vector.shape_cast %2 : vector<1x8x256xf32> to vector<8x256xf32>
    %4 = arith.addf %1, %3 : vector<8x256xf32>
    %c2 = arith.constant 2 : index
    %c0_4 = arith.constant 0 : index
    %c0_5 = arith.constant 0 : index
    %5 = vector.load %arg1[%c2, %c0_4, %c0_5] : memref<3x8x256xf32, #tpu.memory_space<vmem>>, vector<1x8x256xf32>
    %6 = vector.shape_cast %5 : vector<1x8x256xf32> to vector<8x256xf32>
    %7 = arith.addf %4, %6 : vector<8x256xf32>
    %cst = arith.constant 0.333333343 : f32
    %8 = vector.broadcast %cst : f32 to vector<8x256xf32>
    %9 = arith.mulf %7, %8 : vector<8x256xf32>
    %c0_6 = arith.constant 0 : index
    %c0_7 = arith.constant 0 : index
    %c0_8 = arith.constant 0 : index
    %c0_9 = arith.constant 0 : index
    %10 = vector.load %arg2[%c0_6, %c0_7, %c0_8, %c0_9] : memref<2x8x16x256xf32, #tpu.memory_space<vmem>>, vector<1x8x16x256xf32>
    %11 = vector.shape_cast %10 : vector<1x8x16x256xf32> to vector<8x16x256xf32>
    %12 = vector.extract_strided_slice %9 {offsets = [0, 0], sizes = [1, 256], strides = [1, 1]} : vector<8x256xf32> to vector<1x256xf32>
    %13 = vector.shape_cast %12 : vector<1x256xf32> to vector<1x1x256xf32>
    %14 = vector.broadcast %13 : vector<1x1x256xf32> to vector<8x16x256xf32>
    %15 = arith.mulf %11, %14 : vector<8x16x256xf32>
    %cst_10 = arith.constant dense<0.000000e+00> : vector<8x16xf32>
    %16 = vector.multi_reduction <add>, %15, %cst_10 [2] : vector<8x16x256xf32> to vector<8x16xf32>
    %c0_11 = arith.constant 0 : index
    %c0_12 = arith.constant 0 : index
    %17 = vector.load %arg13[%c0_11, %c0_12] : memref<16x64xf32, #tpu.memory_space<vmem>>, vector<8x16xf32>
    tpu.vector_store %arg13[%c0_11, %c0_12], %16 {strides = array<i32>} : memref<16x64xf32, #tpu.memory_space<vmem>>, vector<8x16xf32>,
    %18 = vector.extract_strided_slice %9 {offsets = [1, 0], sizes = [1, 256], strides = [1, 1]} : vector<8x256xf32> to vector<1x256xf32>
    %19 = vector.shape_cast %18 : vector<1x256xf32> to vector<1x1x256xf32>
    %20 = vector.broadcast %19 : vector<1x1x256xf32> to vector<8x16x256xf32>
    %21 = arith.mulf %11, %20 : vector<8x16x256xf32>
    %cst_13 = arith.constant dense<0.000000e+00> : vector<8x16xf32>
    %22 = vector.multi_reduction <add>, %21, %cst_13 [2] : vector<8x16x256xf32> to vector<8x16xf32>
    %c0_14 = arith.constant 0 : index
    %c16 = arith.constant 16 : index
    %23 = vector.load %arg13[%c0_14, %c16] : memref<16x64xf32, #tpu.memory_space<vmem>>, vector<8x16xf32>
    tpu.vector_store %arg13[%c0_14, %c16], %22 {strides = array<i32>} : memref<16x64xf32, #tpu.memory_space<vmem>>, vector<8x16xf32>,
    %24 = vector.extract_strided_slice %9 {offsets = [2, 0], sizes = [1, 256], strides = [1, 1]} : vector<8x256xf32> to vector<1x256xf32>
    %25 = vector.shape_cast %24 : vector<1x256xf32> to vector<1x1x256xf32>
    %26 = vector.broadcast %25 : vector<1x1x256xf32> to vector<8x16x256xf32>
    %27 = arith.mulf %11, %26 : vector<8x16x256xf32>
    %cst_15 = arith.constant dense<0.000000e+00> : vector<8x16xf32>
    %28 = vector.multi_reduction <add>, %27, %cst_15 [2] : vector<8x16x256xf32> to vector<8x16xf32>
    %c0_16 = arith.constant 0 : index
    %c32 = arith.constant 32 : index
    %29 = vector.load %arg13[%c0_16, %c32] : memref<16x64xf32, #tpu.memory_space<vmem>>, vector<8x16xf32>
    tpu.vector_store %arg13[%c0_16, %c32], %28 {strides = array<i32>} : memref<16x64xf32, #tpu.memory_space<vmem>>, vector<8x16xf32>,
    %30 = vector.extract_strided_slice %9 {offsets = [3, 0], sizes = [1, 256], strides = [1, 1]} : vector<8x256xf32> to vector<1x256xf32>
    %31 = vector.shape_cast %30 : vector<1x256xf32> to vector<1x1x256xf32>
    %32 = vector.broadcast %31 : vector<1x1x256xf32> to vector<8x16x256xf32>
    %33 = arith.mulf %11, %32 : vector<8x16x256xf32>
    %cst_17 = arith.constant dense<0.000000e+00> : vector<8x16xf32>
    %34 = vector.multi_reduction <add>, %33, %cst_17 [2] : vector<8x16x256xf32> to vector<8x16xf32>
    %c0_18 = arith.constant 0 : index
    %c48 = arith.constant 48 : index
    %35 = vector.load %arg13[%c0_18, %c48] : memref<16x64xf32, #tpu.memory_space<vmem>>, vector<8x16xf32>
    tpu.vector_store %arg13[%c0_18, %c48], %34 {strides = array<i32>} : memref<16x64xf32, #tpu.memory_space<vmem>>, vector<8x16xf32>,
    %c1_19 = arith.constant 1 : index
    %c0_20 = arith.constant 0 : index
    %c0_21 = arith.constant 0 : index
    %c0_22 = arith.constant 0 : index
    %36 = vector.load %arg2[%c1_19, %c0_20, %c0_21, %c0_22] : memref<2x8x16x256xf32, #tpu.memory_space<vmem>>, vector<1x8x16x256xf32>
    %37 = vector.shape_cast %36 : vector<1x8x16x256xf32> to vector<8x16x256xf32>
    %38 = vector.extract_strided_slice %9 {offsets = [4, 0], sizes = [1, 256], strides = [1, 1]} : vector<8x256xf32> to vector<1x256xf32>
    %39 = vector.shape_cast %38 : vector<1x256xf32> to vector<1x1x256xf32>
    %40 = vector.broadcast %39 : vector<1x1x256xf32> to vector<8x16x256xf32>
    %41 = arith.mulf %37, %40 : vector<8x16x256xf32>
    %cst_23 = arith.constant dense<0.000000e+00> : vector<8x16xf32>
    %42 = vector.multi_reduction <add>, %41, %cst_23 [2] : vector<8x16x256xf32> to vector<8x16xf32>
    %c8 = arith.constant 8 : index
    %c0_24 = arith.constant 0 : index
    %43 = vector.load %arg13[%c8, %c0_24] : memref<16x64xf32, #tpu.memory_space<vmem>>, vector<8x16xf32>
    tpu.vector_store %arg13[%c8, %c0_24], %42 {strides = array<i32>} : memref<16x64xf32, #tpu.memory_space<vmem>>, vector<8x16xf32>,
    %44 = vector.extract_strided_slice %9 {offsets = [5, 0], sizes = [1, 256], strides = [1, 1]} : vector<8x256xf32> to vector<1x256xf32>
    %45 = vector.shape_cast %44 : vector<1x256xf32> to vector<1x1x256xf32>
    %46 = vector.broadcast %45 : vector<1x1x256xf32> to vector<8x16x256xf32>
    %47 = arith.mulf %37, %46 : vector<8x16x256xf32>
    %cst_25 = arith.constant dense<0.000000e+00> : vector<8x16xf32>
    %48 = vector.multi_reduction <add>, %47, %cst_25 [2] : vector<8x16x256xf32> to vector<8x16xf32>
    %c8_26 = arith.constant 8 : index
    %c16_27 = arith.constant 16 : index
    %49 = vector.load %arg13[%c8_26, %c16_27] : memref<16x64xf32, #tpu.memory_space<vmem>>, vector<8x16xf32>
    tpu.vector_store %arg13[%c8_26, %c16_27], %48 {strides = array<i32>} : memref<16x64xf32, #tpu.memory_space<vmem>>, vector<8x16xf32>,
    %50 = vector.extract_strided_slice %9 {offsets = [6, 0], sizes = [1, 256], strides = [1, 1]} : vector<8x256xf32> to vector<1x256xf32>
    %51 = vector.shape_cast %50 : vector<1x256xf32> to vector<1x1x256xf32>
    %52 = vector.broadcast %51 : vector<1x1x256xf32> to vector<8x16x256xf32>
    %53 = arith.mulf %37, %52 : vector<8x16x256xf32>
    %cst_28 = arith.constant dense<0.000000e+00> : vector<8x16xf32>
    %54 = vector.multi_reduction <add>, %53, %cst_28 [2] : vector<8x16x256xf32> to vector<8x16xf32>
    %c8_29 = arith.constant 8 : index
    %c32_30 = arith.constant 32 : index
    %55 = vector.load %arg13[%c8_29, %c32_30] : memref<16x64xf32, #tpu.memory_space<vmem>>, vector<8x16xf32>
    tpu.vector_store %arg13[%c8_29, %c32_30], %54 {strides = array<i32>} : memref<16x64xf32, #tpu.memory_space<vmem>>, vector<8x16xf32>,
    %56 = vector.extract_strided_slice %9 {offsets = [7, 0], sizes = [1, 256], strides = [1, 1]} : vector<8x256xf32> to vector<1x256xf32>
    %57 = vector.shape_cast %56 : vector<1x256xf32> to vector<1x1x256xf32>
    %58 = vector.broadcast %57 : vector<1x1x256xf32> to vector<8x16x256xf32>
    %59 = arith.mulf %37, %58 : vector<8x16x256xf32>
    %cst_31 = arith.constant dense<0.000000e+00> : vector<8x16xf32>
    %60 = vector.multi_reduction <add>, %59, %cst_31 [2] : vector<8x16x256xf32> to vector<8x16xf32>
    %c8_32 = arith.constant 8 : index
    %c48_33 = arith.constant 48 : index
    %61 = vector.load %arg13[%c8_32, %c48_33] : memref<16x64xf32, #tpu.memory_space<vmem>>, vector<8x16xf32>
    tpu.vector_store %arg13[%c8_32, %c48_33], %60 {strides = array<i32>} : memref<16x64xf32, #tpu.memory_space<vmem>>, vector<8x16xf32>,
    %c0_34 = arith.constant 0 : index
    %c0_35 = arith.constant 0 : index
    %62 = vector.load %arg13[%c0_34, %c0_35] : memref<16x64xf32, #tpu.memory_space<vmem>>, vector<16x64xf32>
    %c0_36 = arith.constant 0 : index
    %c0_37 = arith.constant 0 : index
    %63 = vector.load %arg5[%c0_36, %c0_37] : memref<64x32xf32, #tpu.memory_space<vmem>>, vector<64x32xf32>
    %cst_38 = arith.constant dense<0.000000e+00> : vector<16x32xf32>
    %64 = tpu.matmul %62, %63, %cst_38 {dimension_numbers = #tpu.dot_dimension_numbers<[1], [0], [0], [1], [0, 0, 1, 1], [], []>} : vector<16x64xf32>, vector<64x32xf32>, vector<16x32xf32> -> vector<16x32xf32>
    %c0_39 = arith.constant 0 : index
    %c0_40 = arith.constant 0 : index
    %65 = vector.load %arg6[%c0_39, %c0_40] : memref<1x32xf32, #tpu.memory_space<vmem>>, vector<1x32xf32>
    %66 = vector.broadcast %65 : vector<1x32xf32> to vector<16x32xf32>
    %67 = arith.addf %64, %66 : vector<16x32xf32>
    %c0_41 = arith.constant 0 : index
    %c0_42 = arith.constant 0 : index
    %68 = vector.load %arg3[%c0_41, %c0_42] : memref<16x1xf32, #tpu.memory_space<vmem>>, vector<16x1xf32>
    %c0_43 = arith.constant 0 : index
    %c0_44 = arith.constant 0 : index
    %69 = vector.load %arg7[%c0_43, %c0_44] : memref<1x32xf32, #tpu.memory_space<vmem>>, vector<1x32xf32>
    %70 = vector.broadcast %68 : vector<16x1xf32> to vector<16x32xf32>
    %71 = vector.broadcast %69 : vector<1x32xf32> to vector<16x32xf32>
    %72 = arith.mulf %70, %71 : vector<16x32xf32>
    %73 = arith.addf %67, %72 : vector<16x32xf32>
    %c0_45 = arith.constant 0 : index
    %c0_46 = arith.constant 0 : index
    %74 = vector.load %arg8[%c0_45, %c0_46] : memref<1x32xf32, #tpu.memory_space<vmem>>, vector<1x32xf32>
    %75 = vector.broadcast %74 : vector<1x32xf32> to vector<16x32xf32>
    %76 = arith.addf %73, %75 : vector<16x32xf32>
    %c0_47 = arith.constant 0 : index
    %c0_48 = arith.constant 0 : index
    %77 = vector.load %arg4[%c0_47, %c0_48] : memref<16x1xf32, #tpu.memory_space<vmem>>, vector<16x1xf32>
    %cst_49 = arith.constant 5.000000e-01 : f32
    %78 = vector.broadcast %cst_49 : f32 to vector<16x1xf32>
    %79 = arith.cmpf ogt, %77, %78 : vector<16x1xf32>
    %cst_50 = arith.constant 0.000000e+00 : f32
    %80 = vector.shape_cast %79 : vector<16x1xi1> to vector<16x1xi1>
    %81 = vector.broadcast %80 : vector<16x1xi1> to vector<16x32xi1>
    %82 = vector.broadcast %cst_50 : f32 to vector<16x32xf32>
    %83 = arith.select %81, %76, %82 : vector<16x32xi1>, vector<16x32xf32>
    %84 = arith.mulf %83, %83 : vector<16x32xf32>
    %cst_51 = arith.constant dense<0.000000e+00> : vector<16xf32>
    %85 = vector.multi_reduction <add>, %84, %cst_51 [1] : vector<16x32xf32> to vector<16xf32>
    %86 = vector.shape_cast %85 : vector<16xf32> to vector<16x1xf32>
    %c0_52 = arith.constant 0 : index
    %c0_53 = arith.constant 0 : index
    %87 = vector.load %arg9[%c0_52, %c0_53] : memref<32x4xf32, #tpu.memory_space<vmem>>, vector<32x4xf32>
    %cst_54 = arith.constant dense<0.000000e+00> : vector<16x4xf32>
    %88 = tpu.matmul %83, %87, %cst_54 {dimension_numbers = #tpu.dot_dimension_numbers<[1], [0], [0], [1], [0, 0, 1, 1], [], []>} : vector<16x32xf32>, vector<32x4xf32>, vector<16x4xf32> -> vector<16x4xf32>
    %c0_55 = arith.constant 0 : index
    %c0_56 = arith.constant 0 : index
    %89 = vector.load %arg10[%c0_55, %c0_56] : memref<1x4xf32, #tpu.memory_space<vmem>>, vector<1x4xf32>
    %90 = vector.broadcast %86 : vector<16x1xf32> to vector<16x4xf32>
    %91 = vector.broadcast %89 : vector<1x4xf32> to vector<16x4xf32>
    %92 = arith.addf %90, %91 : vector<16x4xf32>
    %cst_57 = arith.constant 2.000000e+00 : f32
    %93 = vector.broadcast %cst_57 : f32 to vector<16x4xf32>
    %94 = arith.mulf %93, %88 : vector<16x4xf32>
    %95 = arith.subf %92, %94 : vector<16x4xf32>
    %cst_58 = arith.constant 0.000000e+00 : f32
    %96 = vector.broadcast %cst_58 : f32 to vector<16x4xf32>
    %97 = arith.maximumf %95, %96 : vector<16x4xf32>
    %98 = math.sqrt %97 : vector<16x4xf32>
    %cst_59 = arith.constant 1.000000e+00 : f32
    %99 = vector.broadcast %cst_59 : f32 to vector<16x4xf32>
    %100 = arith.mulf %98, %99 : vector<16x4xf32>
    %cst_60 = arith.constant 1.000000e+00 : f32
    %101 = vector.broadcast %cst_60 : f32 to vector<16x4xf32>
    %102 = arith.addf %101, %100 : vector<16x4xf32>
    %103 = tpu.reciprocal %102 : vector<16x4xf32> -> vector<16x4xf32>
    %cst_61 = arith.constant dense<0.000000e+00> : vector<16xf32>
    %104 = vector.multi_reduction <add>, %103, %cst_61 [1] : vector<16x4xf32> to vector<16xf32>
    %105 = vector.shape_cast %104 : vector<16xf32> to vector<16x1xf32>
    %106 = tpu.reciprocal %105 : vector<16x1xf32> -> vector<16x1xf32>
    %107 = vector.broadcast %106 : vector<16x1xf32> to vector<16x4xf32>
    %108 = arith.mulf %103, %107 : vector<16x4xf32>
    %c0_62 = arith.constant 0 : index
    %c0_63 = arith.constant 0 : index
    %109 = vector.load %arg11[%c0_62, %c0_63] : memref<16x32xf32, #tpu.memory_space<vmem>>, vector<16x32xf32>
    tpu.vector_store %arg11[%c0_62, %c0_63], %83 {strides = array<i32>} : memref<16x32xf32, #tpu.memory_space<vmem>>, vector<16x32xf32>,
    %cst_64 = arith.constant 0.000000e+00 : f32
    %110 = vector.shape_cast %79 : vector<16x1xi1> to vector<16x1xi1>
    %111 = vector.broadcast %110 : vector<16x1xi1> to vector<16x4xi1>
    %112 = vector.broadcast %cst_64 : f32 to vector<16x4xf32>
    %113 = arith.select %111, %108, %112 : vector<16x4xi1>, vector<16x4xf32>
    %c0_65 = arith.constant 0 : index
    %c0_66 = arith.constant 0 : index
    %114 = vector.load %arg12[%c0_65, %c0_66] : memref<16x4xf32, #tpu.memory_space<vmem>>, vector<16x4xf32>
    tpu.vector_store %arg12[%c0_65, %c0_66], %113 {strides = array<i32>} : memref<16x4xf32, #tpu.memory_space<vmem>>, vector<16x4xf32>,
    return
  }
  func.func @transform_0(%arg0: i32) -> (i32, i32, i32) {
    %c0_i32 = arith.constant 0 : i32
    %c0_i32_0 = arith.constant 0 : i32
    %c0_i32_1 = arith.constant 0 : i32
    %c0_i32_2 = arith.constant 0 : i32
    return %c0_i32, %c0_i32_0, %c0_i32_1 : i32, i32, i32
  }
  func.func @transform_1(%arg0: i32) -> (i32, i32, i32, i32) {
    %c0_i32 = arith.constant 0 : i32
    %c0_i32_0 = arith.constant 0 : i32
    %c0_i32_1 = arith.constant 0 : i32
    %c0_i32_2 = arith.constant 0 : i32
    %c0_i32_3 = arith.constant 0 : i32
    return %c0_i32, %c0_i32_0, %c0_i32_1, %c0_i32_2 : i32, i32, i32, i32
  }
  func.func @transform_2(%arg0: i32) -> (i32, i32) {
    %c0_i32 = arith.constant 0 : i32
    %c0_i32_0 = arith.constant 0 : i32
    %c0_i32_1 = arith.constant 0 : i32
    return %c0_i32, %c0_i32_0 : i32, i32
  }
  func.func @transform_3(%arg0: i32) -> (i32, i32) {
    %c0_i32 = arith.constant 0 : i32
    %c0_i32_0 = arith.constant 0 : i32
    %c0_i32_1 = arith.constant 0 : i32
    return %c0_i32, %c0_i32_0 : i32, i32
  }
  func.func @transform_4(%arg0: i32) -> (i32, i32) {
    %c0_i32 = arith.constant 0 : i32
    %c0_i32_0 = arith.constant 0 : i32
    %c0_i32_1 = arith.constant 0 : i32
    return %c0_i32, %c0_i32_0 : i32, i32
  }
  func.func @transform_5(%arg0: i32) -> (i32, i32) {
    %c0_i32 = arith.constant 0 : i32
    %c0_i32_0 = arith.constant 0 : i32
    %c0_i32_1 = arith.constant 0 : i32
    return %c0_i32, %c0_i32_0 : i32, i32
  }
  func.func @transform_6(%arg0: i32) -> (i32, i32) {
    %c0_i32 = arith.constant 0 : i32
    %c0_i32_0 = arith.constant 0 : i32
    %c0_i32_1 = arith.constant 0 : i32
    return %c0_i32, %c0_i32_0 : i32, i32
  }
  func.func @transform_7(%arg0: i32) -> (i32, i32) {
    %c0_i32 = arith.constant 0 : i32
    %c0_i32_0 = arith.constant 0 : i32
    %c0_i32_1 = arith.constant 0 : i32
    return %c0_i32, %c0_i32_0 : i32, i32
  }
  func.func @transform_8(%arg0: i32) -> (i32, i32) {
    %c0_i32 = arith.constant 0 : i32
    %c0_i32_0 = arith.constant 0 : i32
    %c0_i32_1 = arith.constant 0 : i32
    return %c0_i32, %c0_i32_0 : i32, i32
  }
  func.func @transform_9(%arg0: i32) -> (i32, i32) {
    %c0_i32 = arith.constant 0 : i32
    %c0_i32_0 = arith.constant 0 : i32
    %c0_i32_1 = arith.constant 0 : i32
    return %c0_i32, %c0_i32_0 : i32, i32
  }
  func.func @transform_10(%arg0: i32) -> (i32, i32) {
    %c0_i32 = arith.constant 0 : i32
    %c0_i32_0 = arith.constant 0 : i32
    %c0_i32_1 = arith.constant 0 : i32
    return %c0_i32, %c0_i32_0 : i32, i32
  }
  func.func @transform_11(%arg0: i32) -> (i32, i32) {
    %c0_i32 = arith.constant 0 : i32
    %c0_i32_0 = arith.constant 0 : i32
    %c0_i32_1 = arith.constant 0 : i32
    return %c0_i32, %c0_i32_0 : i32, i32
  }
}

</mosaic_0001>

<bundles_post_ra>
// kernel: clustering_forward.1
= control target key start
LH: loop header
LB: loop body
LE: loop exit
PB: predicated region body
PF: predicated region fallthrough
CT: control target
= control target key end

     0   :  { %s3008_s0 = inlined_call_operand.vmem [shape: f32[3,8,256], index: 0, kind: input, shape index: {}]   ;;  %s3009_s1 = inlined_call_operand.vmem [shape: f32[2,8,16,256], index: 1, kind: input, shape index: {}]   ;;  %s3010_s2 = inlined_call_operand.vmem [shape: f32[16,1], index: 2, kind: input, shape index: {}]   ;;  %s3011_s3 = inlined_call_operand.vmem [shape: f32[16,1], index: 3, kind: input, shape index: {}]   ;;  %s3012_s4 = inlined_call_operand.vmem [shape: f32[64,32], index: 4, kind: input, shape index: {}]   ;;  %s3013_s5 = inlined_call_operand.vmem [shape: f32[1,32], index: 5, kind: input, shape index: {}]   ;;  %s3014_s6 = inlined_call_operand.vmem [shape: f32[1,32], index: 6, kind: input, shape index: {}]   ;;  %s3015_s7 = inlined_call_operand.vmem [shape: f32[1,32], index: 7, kind: input, shape index: {}]   ;;  %s3016_s8 = inlined_call_operand.vmem [shape: f32[32,4], index: 8, kind: input, shape index: {}]   ;;  %s3017_s9 = inlined_call_operand.vmem [shape: f32[1,4], index: 9, kind: input, shape index: {}]   ;;  %s3018_s10 = inlined_call_operand.hbm [shape: f32[16,32], index: 10, kind: output, shape index: {0}]   ;;  %s3019_s11 = inlined_call_operand.vmem [shape: f32[16,4], index: 11, kind: output, shape index: {1}]  }
   0x1   :  { %v38_v0 = vld [vmem:[%s3008_s0] sm:$0xff]  ;;  %v39_v1 = vld [vmem:[%s3008_s0 + $0x8] sm:$0xff]  ;;  %v1448_v2 = vld [vmem:[%s3008_s0 + $0x10] sm:$0xff] }
   0x2   :  { %v1449_v3 = vld [vmem:[%s3008_s0 + $0x18] sm:$0xff]  ;;  %v43_v4 = vadd.f32 %v1448_v2, %v38_v0  ;;  %v1450_v5 = vld [vmem:[%s3008_s0 + $0x20] sm:$0xff]  ;;  %v1451_v6 = vld [vmem:[%s3008_s0 + $0x28] sm:$0xff] }
   0x3   :  { %v44_v7 = vadd.f32 %v1449_v3, %v39_v1  ;;  %v1632_v11 = vld [vmem:[%s3009_s1 + $0x40] sm:$0xff]  ;;  %v1639_v13 = vld [vmem:[%s3009_s1 + $0x48] sm:$0xff] }
   0x4   :  { %v48_v8 = vadd.f32 %v1450_v5, %v43_v4  ;;  %v1644_v14 = vld [vmem:[%s3009_s1 + $0x20] sm:$0xff]  ;;  %v1657_v17 = vld [vmem:[%s3009_s1 + $0x28] sm:$0xff] }
   0x5   :  { %v49_v9 = vadd.f32 %v1451_v6, %v44_v7  ;;  %v1649_v15 = vld [vmem:[%s3009_s1] sm:$0xff]  ;;  %v1662_v18 = vld [vmem:[%s3009_s1 + $0x8] sm:$0xff] }
   0x6   :  { %v1627_v10 = vmul.f32 0.33333334, %v48_v8 }
   0x7   :  { %v1634_v12 = vmul.f32 0.33333334, %v49_v9 }
   0x8   :  { %v1652_v16 = vperm.slane %v1627_v10, 0 }
   0x9   :  { %v1665_v19 = vperm.slane %v1634_v12, 0 }
   0xa   :  { %3058 = vst [vmem:[#allocation6_spill] sm:$0xff] %v1652_v16  ;;  %v94_v20 = vmul.f32 %v1652_v16, %v1632_v11  ;;  %v90_v21 = vmul.f32 %v1652_v16, %v1644_v14  ;;  %v86_v22 = vmul.f32 %v1652_v16, %v1649_v15 }
   0xb   :  { %3059 = vst [vmem:[#allocation7_spill] sm:$0xff] %v1665_v19 }
   0xc   :  { %17 = vsyncpa [#allocation4], 0  ;;  %v95_v23 = vmul.f32 %v1665_v19, %v1639_v13  ;;  %v91_v24 = vmul.f32 %v1665_v19, %v1657_v17  ;;  %v87_v25 = vmul.f32 %v1665_v19, %v1662_v18  ;;  %v1682_v26 = vld [vmem:[%s3009_s1 + $0x50] sm:$0xff]  ;;  %v1687_v27 = vld [vmem:[%s3009_s1 + $0x58] sm:$0xff]  ;;  %v1722_v41 = vperm.slane %v1627_v10, 1  ;;  %s1432_s12 = sshll.u32 %s3018_s10, 4  ;;  %s1433_s12 = int_to_ptr.hbm [resolvable:$true] %s1432_s12 }
   0xd   :  { %v1692_v28 = vld [vmem:[%s3009_s1 + $0x30] sm:$0xff]  ;;  %v1697_v29 = vld [vmem:[%s3009_s1 + $0x38] sm:$0xff]  ;;  %v96_v35 = vmul.f32 %v1652_v16, %v1682_v26  ;;  %v97_v36 = vmul.f32 %v1665_v19, %v1687_v27  ;;  %v1725_v44 = vperm.slane %v1634_v12, 1  ;;  %v1752_v57 = vld [vmem:[%s3009_s1 + $0x60] sm:$0xff]  ;;  %v1772_v1 = vperm.slane %v1627_v10, 2  ;;  %s1547_s13 = smov 128  }
   0xe   :  { %v130_v30 = vadd.f32 %v95_v23, %v94_v20  ;;  %v124_v31 = vadd.f32 %v91_v24, %v90_v21  ;;  %v118_v32 = vadd.f32 %v87_v25, %v86_v22  ;;  %v1702_v33 = vld [vmem:[%s3009_s1 + $0x10] sm:$0xff]  ;;  %v1707_v34 = vld [vmem:[%s3009_s1 + $0x18] sm:$0xff]  ;;  %v92_v37 = vmul.f32 %v1652_v16, %v1692_v28  ;;  %v1757_v58 = vld [vmem:[%s3009_s1 + $0x68] sm:$0xff]  ;;  %s1548_s14 = smov 8  }
   0xf   :  { %v93_v38 = vmul.f32 %v1665_v19, %v1697_v29  ;;  %v88_v39 = vmul.f32 %v1652_v16, %v1702_v33  ;;  %v89_v40 = vmul.f32 %v1665_v19, %v1707_v34  ;;  %v133_v42 = vadd.f32 %v97_v36, %v96_v35  ;;  %v1742_v54 = vld [vmem:[%s3009_s1 + $0x70] sm:$0xff]  ;;  %v1747_v56 = vld [vmem:[%s3009_s1 + $0x78] sm:$0xff] }
  0x10   :  { %131 = vadd.xlane.f32.xlu2 %v130_v30  ;;  %125 = vadd.xlane.f32.xlu1 %v124_v31  ;;  %v233_v46 = vmul.f32 %v1722_v41, %v1644_v14  ;;  %v234_v47 = vmul.f32 %v1725_v44, %v1657_v17  ;;  %v231_v48 = vmul.f32 %v1722_v41, %v1702_v33  ;;  %v1775_v4 = vperm.slane %v1634_v12, 2 }
  0x11   :  { %119 = vadd.xlane.f32.xlu0 %v118_v32  ;;  %v127_v43 = vadd.f32 %v93_v38, %v92_v37  ;;  %v121_v45 = vadd.f32 %v89_v40, %v88_v39  ;;  %v232_v49 = vmul.f32 %v1725_v44, %v1707_v34  ;;  %v229_v50 = vmul.f32 %v1722_v41, %v1649_v15 }
  0x12   :  { %v230_v51 = vmul.f32 %v1725_v44, %v1662_v18  ;;  %v267_v52 = vadd.f32 %v234_v47, %v233_v46  ;;  %v100_v59 = vmul.f32 %v1652_v16, %v1742_v54  ;;  %v101_v60 = vmul.f32 %v1665_v19, %v1747_v56  ;;  %v1821_v46 = vld [vmem:[%s3009_s1 + $0x128] sm:$0xff]  ;;  %v1826_v47 = vld [vmem:[%s3009_s1 + $0x110] sm:$0xff] }
  0x13   :  { %v264_v53 = vadd.f32 %v232_v49, %v231_v48  ;;  %v98_v61 = vmul.f32 %v1652_v16, %v1752_v57  ;;  %v99_v62 = vmul.f32 %v1665_v19, %v1757_v58  ;;  %v235_v63 = vmul.f32 %v1722_v41, %v1692_v28  ;;  %v1831_v49 = vld [vmem:[%s3009_s1 + $0x118] sm:$0xff] }
  0x14   :  { %v261_v55 = vadd.f32 %v230_v51, %v229_v50  ;;  %v236_v0 = vmul.f32 %v1725_v44, %v1697_v29  ;;  %v139_v2 = vadd.f32 %v101_v60, %v100_v59  ;;  %v364_v6 = vmul.f32 %v1772_v1, %v1649_v15  ;;  %v1836_v50 = vld [vmem:[%s3009_s1 + $0x100] sm:$0xff]  ;;  %v1841_v51 = vld [vmem:[%s3009_s1 + $0x108] sm:$0xff] }
  0x15   :  { %v136_v3 = vadd.f32 %v99_v62, %v98_v61  ;;  %v365_v7 = vmul.f32 %v1775_v4, %v1662_v18  ;;  %v239_v8 = vmul.f32 %v1722_v41, %v1682_v26  ;;  %v240_v9 = vmul.f32 %v1725_v44, %v1687_v27 }
  0x16   :  { %v270_v5 = vadd.f32 %v236_v0, %v235_v63  ;;  %v237_v20 = vmul.f32 %v1722_v41, %v1632_v11  ;;  %v238_v21 = vmul.f32 %v1725_v44, %v1639_v13  ;;  %v370_v25 = vmul.f32 %v1772_v1, %v1692_v28 }
  0x17   :  { %v396_v22 = vadd.f32 %v365_v7, %v364_v6  ;;  %v276_v23 = vadd.f32 %v240_v9, %v239_v8  ;;  %v371_v30 = vmul.f32 %v1775_v4, %v1697_v29  ;;  %v368_v31 = vmul.f32 %v1772_v1, %v1644_v14  ;;  %v1872_v6 = vld [vmem:[%s3009_s1 + $0x80] sm:$0xff]  ;;  %v1877_v7 = vld [vmem:[%s3009_s1 + $0x88] sm:$0xff] }
  0x18   :  { %134 = vadd.xlane.f32.xlu2 %v133_v42  ;;  %128 = vadd.xlane.f32.xlu1 %v127_v43  ;;  %v273_v24 = vadd.f32 %v238_v21, %v237_v20  ;;  %v369_v32 = vmul.f32 %v1775_v4, %v1657_v17  ;;  %v366_v35 = vmul.f32 %v1772_v1, %v1702_v33  ;;  %v1802_v37 = vperm.slane %v1627_v10, 3 }
  0x19   :  { %122 = vadd.xlane.f32.xlu0 %v121_v45  ;;  %v367_v36 = vmul.f32 %v1775_v4, %v1707_v34  ;;  %v1805_v38 = vperm.slane %v1634_v12, 3  ;;  %v1808_v39 = vperm.slane %v1627_v10, 4  ;;  %v1811_v40 = vperm.slane %v1634_v12, 4  ;;  %v1816_v45 = vld [vmem:[%s3009_s1 + $0x120] sm:$0xff] }
  0x1a   :  { %v405_v42 = vadd.f32 %v371_v30, %v370_v25  ;;  %v402_v43 = vadd.f32 %v369_v32, %v368_v31  ;;  %v505_v8 = vmul.f32 %v1802_v37, %v1692_v28  ;;  %v503_v20 = vmul.f32 %v1802_v37, %v1644_v14 }
  0x1b   :  { %v399_v48 = vadd.f32 %v367_v36, %v366_v35  ;;  %v672_v59 = vmul.f32 %v1821_v46, %v1811_v40  ;;  %v669_v60 = vmul.f32 %v1826_v47, %v1808_v39  ;;  %v670_v62 = vmul.f32 %v1831_v49, %v1811_v40 }
  0x1c   :  { %v506_v9 = vmul.f32 %v1805_v38, %v1697_v29  ;;  %v504_v21 = vmul.f32 %v1805_v38, %v1657_v17  ;;  %v102_v17 = vmul.f32 %v1652_v16, %v1872_v6  ;;  %v103_v25 = vmul.f32 %v1665_v19, %v1877_v7 }
  0x1d   :  { %v702_v0 = vadd.f32 %v670_v62, %v669_v60  ;;  %vm187_vm0 = vcmask 130112   ;;  %vm210_vm1 = vcmask 1041409   ;;  %vm212_vm2 = vcmask 1042434  }
  0x1e   :  { %v540_v29 = vadd.f32 %v506_v9, %v505_v8  ;;  %v142_v35 = vadd.f32 %v103_v25, %v102_v17  ;;  %v1932_v9 = vld [vmem:[%s3009_s1 + $0x140] sm:$0xff]  ;;  %v1952_v17 = vld [vmem:[%s3009_s1 + $0x150] sm:$0xff]  ;;  %vm329_vm3 = vcmask 261312   ;;  %vm214_vm4 = vcmask 1043459  }
  0x1f   :  { %3060 = vst [vmem:[#allocation8_spill] sm:$0xff] %v1932_v9  ;;  %vm464_vm5 = vcmask 392512   ;;  %vm216_vm6 = vcmask 1044484   ;;  %vm599_vm7 = vcmask 523712   ;;  %vm218_vm8 = vcmask 1045509  }
  0x20   :  { %268 = vadd.xlane.f32.xlu2 %v267_v52  ;;  %265 = vadd.xlane.f32.xlu1 %v264_v53  ;;  %v499_v52 = vmul.f32 %v1802_v37, %v1649_v15  ;;  %v500_v53 = vmul.f32 %v1805_v38, %v1662_v18  ;;  %v667_v15 = vmul.f32 %v1836_v50, %v1808_v39  ;;  %vm220_vm9 = vcmask 1046534  }
  0x21   :  { %262 = vadd.xlane.f32.xlu0 %v261_v55  ;;  %v671_v55 = vmul.f32 %v1816_v45, %v1808_v39  ;;  %v668_v18 = vmul.f32 %v1841_v51, %v1811_v40  ;;  %3062 = vst [vmem:[#allocation10_spill] sm:$0xff] %v1952_v17  ;;  %vm222_vm10 = vcmask 1047559   ;;  %vm225_vm11 = vcmask 130048  }
  0x22   :  { %v531_v61 = vadd.f32 %v500_v53, %v499_v52  ;;  %v244_v52 = vmul.f32 %v1725_v44, %v1747_v56  ;;  %v241_v53 = vmul.f32 %v1722_v41, %v1752_v57  ;;  %vm360_vm12 = vcmask 261248  }
  0x23   :  { %v705_v63 = vadd.f32 %v672_v59, %v671_v55  ;;  %v242_v55 = vmul.f32 %v1725_v44, %v1757_v58  ;;  %vm495_vm13 = vcmask 392448   ;;  %vm630_vm15 = vcmask 523648  }
  0x25   :  { %v279_v62 = vadd.f32 %v242_v55, %v241_v53 }
  0x28   :  { %140 = vadd.xlane.f32.xlu2 %v139_v2  ;;  %137 = vadd.xlane.f32.xlu1 %v136_v3  ;;  %v699_v2 = vadd.f32 %v668_v18, %v667_v15  ;;  %v1862_v3 = vld [vmem:[%s3009_s1 + $0x90] sm:$0xff]  ;;  %v501_v15 = vmul.f32 %v1802_v37, %v1702_v33  ;;  %v502_v18 = vmul.f32 %v1805_v38, %v1707_v34  ;;  %v1937_v33 = vld [vmem:[%s3009_s1 + $0x148] sm:$0xff] }
  0x29   :  { %271 = vadd.xlane.f32.xlu0 %v270_v5  ;;  %v1867_v5 = vld [vmem:[%s3009_s1 + $0x98] sm:$0xff]  ;;  %v104_v28 = vmul.f32 %v1652_v16, %v1862_v3  ;;  %3061 = vst [vmem:[#allocation9_spill] sm:$0xff] %v1937_v33  ;;  %v675_v34 = vmul.f32 %v1932_v9, %v1808_v39 }
  0x2a   :  { %v105_v14 = vmul.f32 %v1665_v19, %v1867_v5 }
  0x2c   :  { %v145_v32 = vadd.f32 %v105_v14, %v104_v28  ;;  %v1947_v14 = vperm.slane %v1634_v12, 5 }
  0x30   :  { %397 = vadd.xlane.f32.xlu2 %v396_v22  ;;  %277 = vadd.xlane.f32.xlu1 %v276_v23  ;;  %v1890_v22 = vld [vmem:[%s3009_s1 + $0x130] sm:$0xff]  ;;  %v1895_v23 = vld [vmem:[%s3009_s1 + $0x138] sm:$0xff] }
  0x31   :  { %274 = vadd.xlane.f32.xlu0 %v273_v24  ;;  %v537_v24 = vadd.f32 %v504_v21, %v503_v20  ;;  %v673_v30 = vmul.f32 %v1890_v22, %v1808_v39  ;;  %v674_v31 = vmul.f32 %v1895_v23, %v1811_v40  ;;  %v676_v20 = vmul.f32 %v1937_v33, %v1811_v40 }
  0x32   :  { %v1944_v21 = vperm.slane %v1627_v10, 5 }
  0x33   :  { %v708_v36 = vadd.f32 %v674_v31, %v673_v30  ;;  %v711_v28 = vadd.f32 %v676_v20, %v675_v34  ;;  %v801_v30 = vmul.f32 %v1831_v49, %v1947_v14  ;;  %v248_v34 = vmul.f32 %v1725_v44, %v1867_v5 }
  0x34   :  { %v800_v25 = vmul.f32 %v1826_v47, %v1944_v21  ;;  %v798_v31 = vmul.f32 %v1836_v50, %v1944_v21  ;;  %v804_v55 = vmul.f32 %v1890_v22, %v1944_v21  ;;  %v245_v20 = vmul.f32 %v1722_v41, %v1872_v6 }
  0x38   :  { %406 = vadd.xlane.f32.xlu2 %v405_v42  ;;  %403 = vadd.xlane.f32.xlu1 %v402_v43  ;;  %v372_v42 = vmul.f32 %v1772_v1, %v1632_v11  ;;  %v373_v43 = vmul.f32 %v1775_v4, %v1639_v13 }
  0x39   :  { %400 = vadd.xlane.f32.xlu0 %v399_v48  ;;  %v243_v48 = vmul.f32 %v1722_v41, %v1742_v54 }
  0x3a   :  { %v408_v59 = vadd.f32 %v373_v43, %v372_v42  ;;  %v833_v42 = vadd.f32 %v801_v30, %v800_v25 }
  0x3b   :  { %v282_v60 = vadd.f32 %v244_v52, %v243_v48  ;;  %v1979_v52 = vld [vmem:[%s3009_s1 + $0xa8] sm:$0xff] }
  0x3c   :  { %3065 = vst [vmem:[#allocation13_spill] sm:$0xff] %v1979_v52  ;;  %v107_v53 = vmul.f32 %v1665_v19, %v1979_v52 }
  0x40   :  { %706 = vadd.xlane.f32.xlu2 %v705_v63  ;;  %703 = vadd.xlane.f32.xlu1 %v702_v0  ;;  %v374_v63 = vmul.f32 %v1772_v1, %v1682_v26  ;;  %v375_v0 = vmul.f32 %v1775_v4, %v1687_v27 }
  0x41   :  { %700 = vadd.xlane.f32.xlu0 %v699_v2  ;;  %v534_v2 = vadd.f32 %v502_v18, %v501_v15 }
  0x42   :  { %v411_v8 = vadd.f32 %v375_v0, %v374_v63  ;;  %v1996_v0 = vld [vmem:[%s3009_s1 + $0xb0] sm:$0xff] }
  0x43   :  { %3066 = vst [vmem:[#allocation14_spill] sm:$0xff] %v1996_v0  ;;  %v108_v25 = vmul.f32 %v1652_v16, %v1996_v0 }
  0x48   :  { %146 = vadd.xlane.f32.xlu2 %v145_v32  ;;  %143 = vadd.xlane.f32.xlu1 %v142_v35  ;;  %v799_v32 = vmul.f32 %v1841_v51, %v1947_v14  ;;  %v677_v35 = vmul.f32 %v1952_v17, %v1808_v39 }
  0x49   :  { %709 = vadd.xlane.f32.xlu0 %v708_v36 }
  0x4a   :  { %v830_v43 = vadd.f32 %v799_v32, %v798_v31 }
  0x50   :  { %409 = vadd.xlane.f32.xlu2 %v408_v59  ;;  %283 = vadd.xlane.f32.xlu1 %v282_v60  ;;  %v805_v59 = vmul.f32 %v1895_v23, %v1947_v14  ;;  %v802_v60 = vmul.f32 %v1816_v45, %v1944_v21 }
  0x51   :  { %280 = vadd.xlane.f32.xlu0 %v279_v62  ;;  %v803_v62 = vmul.f32 %v1821_v46, %v1947_v14 }
  0x52   :  { %v839_v18 = vadd.f32 %v805_v59, %v804_v55  ;;  %v2030_v59 = vld [vmem:[%s3009_s1 + $0x170] sm:$0xff] }
  0x53   :  { %v836_v63 = vadd.f32 %v803_v62, %v802_v60  ;;  %v2035_v60 = vld [vmem:[%s3009_s1 + $0x178] sm:$0xff]  ;;  %v2040_v62 = vld [vmem:[%s3009_s1 + $0x160] sm:$0xff] }
  0x54   :  { %3068 = vst [vmem:[#allocation16_spill] sm:$0xff] %v2035_v60 }
  0x55   :  { %3069 = vst [vmem:[#allocation17_spill] sm:$0xff] %v2040_v62 }
  0x58   :  { %535 = vadd.xlane.f32.xlu2 %v534_v2  ;;  %532 = vadd.xlane.f32.xlu1 %v531_v61  ;;  %v1957_v61 = vld [vmem:[%s3009_s1 + $0x158] sm:$0xff] }
  0x59   :  { %412 = vadd.xlane.f32.xlu0 %v411_v8  ;;  %3063 = vst [vmem:[#allocation11_spill] sm:$0xff] %v1957_v61  ;;  %v678_v36 = vmul.f32 %v1957_v61, %v1811_v40  ;;  %v2001_v2 = vld [vmem:[%s3009_s1 + $0xb8] sm:$0xff]  ;;  %v247_v8 = vmul.f32 %v1722_v41, %v1862_v3 }
  0x5a   :  { %3067 = vst [vmem:[#allocation15_spill] sm:$0xff] %v2001_v2  ;;  %v109_v30 = vmul.f32 %v1665_v19, %v2001_v2 }
  0x5b   :  { %v714_v48 = vadd.f32 %v678_v36, %v677_v35  ;;  %v288_v31 = vadd.f32 %v248_v34, %v247_v8  ;;  %v507_v36 = vmul.f32 %v1802_v37, %v1632_v11  ;;  %v679_v8 = vmul.f32 %v2040_v62, %v1808_v39 }
  0x5c   :  { %v151_v35 = vadd.f32 %v109_v30, %v108_v25  ;;  %v182_v25 = vlaneseq }
  0x60   :  { %712 = vadd.xlane.f32.xlu2 %v711_v28  ;;  %541 = vadd.xlane.f32.xlu1 %v540_v29  ;;  %v1974_v29 = vld [vmem:[%s3009_s1 + $0xa0] sm:$0xff]  ;;  %v246_v28 = vmul.f32 %v1725_v44, %v1877_v7 }
  0x61   :  { %538 = vadd.xlane.f32.xlu0 %v537_v24  ;;  %3064 = vst [vmem:[#allocation12_spill] sm:$0xff] %v1974_v29  ;;  %v106_v24 = vmul.f32 %v1652_v16, %v1974_v29 }
  0x62   :  { %v285_v32 = vadd.f32 %v246_v28, %v245_v20  ;;  %v509_v20 = vmul.f32 %v1802_v37, %v1682_v26  ;;  %v510_v28 = vmul.f32 %v1805_v38, %v1687_v27 }
  0x63   :  { %v148_v15 = vadd.f32 %v107_v53, %v106_v24  ;;  %v376_v24 = vmul.f32 %v1772_v1, %v1752_v57  ;;  %v377_v53 = vmul.f32 %v1775_v4, %v1757_v58 }
  0x68   :  { %834 = vadd.xlane.f32.xlu2 %v833_v42  ;;  %831 = vadd.xlane.f32.xlu1 %v830_v43  ;;  %v508_v42 = vmul.f32 %v1805_v38, %v1639_v13  ;;  %v378_v43 = vmul.f32 %v1772_v1, %v1742_v54  ;;  %v414_v13 = vadd.f32 %v377_v53, %v376_v24  ;;  %v2065_v24 = vand.u32 127, %v182_v25 }
  0x69   :  { %715 = vadd.xlane.f32.xlu0 %v714_v48  ;;  %v379_v48 = vmul.f32 %v1775_v4, %v1747_v56 }
  0x6a   :  { %v543_v55 = vadd.f32 %v508_v42, %v507_v36  ;;  %v2072_v53 = vadd.s32 4294967288, %v2065_v24 }
  0x6b   :  { %v417_v11 = vadd.f32 %v379_v48, %v378_v43  ;;  %v546_v48 = vadd.f32 %v510_v28, %v509_v20 }
  0x70   :  { %149 = vadd.xlane.f32.xlu2 %v148_v15  ;;  %840 = vadd.xlane.f32.xlu1 %v839_v18  ;;  %v2045_v15 = vld [vmem:[%s3009_s1 + $0x168] sm:$0xff]  ;;  %v681_v18 = vmul.f32 %v2030_v59, %v1808_v39 }
  0x71   :  { %837 = vadd.xlane.f32.xlu0 %v836_v63  ;;  %3070 = vst [vmem:[#allocation18_spill] sm:$0xff] %v2045_v15  ;;  %v682_v63 = vmul.f32 %v2035_v60, %v1811_v40  ;;  %v680_v34 = vmul.f32 %v2045_v15, %v1811_v40 }
  0x73   :  { %v720_v42 = vadd.f32 %v682_v63, %v681_v18  ;;  %v717_v43 = vadd.f32 %v680_v34, %v679_v8  ;;  %v807_v18 = vmul.f32 %v1937_v33, %v1947_v14 }
  0x78   :  { %289 = vadd.xlane.f32.xlu2 %v288_v31  ;;  %286 = vadd.xlane.f32.xlu1 %v285_v32  ;;  %v2060_v32 = vperm.slane %v1627_v10, 6 }
  0x79   :  { %152 = vadd.xlane.f32.xlu0 %v151_v35  ;;  %v2063_v35 = vperm.slane %v1634_v12, 6 }
  0x7a   :  { %v929_v26 = vmul.f32 %v1836_v50, %v2060_v32 }
  0x7b   :  { %3071 = vst [vmem:[#allocation19_spill] sm:$0xff] %v2063_v35  ;;  %v930_v27 = vmul.f32 %v1841_v51, %v2063_v35 }
  0x7d   :  { %v961_v20 = vadd.f32 %v930_v27, %v929_v26  ;;  %v936_v27 = vmul.f32 %v1895_v23, %v2063_v35 }
  0x80   :  { %544 = vadd.xlane.f32.xlu2 %v543_v55  ;;  %418 = vadd.xlane.f32.xlu1 %v417_v11  ;;  %v808_v55 = vmul.f32 %v1952_v17, %v1944_v21  ;;  %v809_v11 = vmul.f32 %v1957_v61, %v1947_v14 }
  0x81   :  { %415 = vadd.xlane.f32.xlu0 %v414_v13  ;;  %v806_v13 = vmul.f32 %v1932_v9, %v1944_v21 }
  0x83   :  { %v132_v30 = vpop.xlane.xlu2 %131  ;;  %v126_v31 = vpop.xlane.xlu1 %125  ;;  %v842_v33 = vadd.f32 %v807_v18, %v806_v13  ;;  %v934_v13 = vmul.f32 %v1821_v46, %v2063_v35 }
  0x84   :  { %v120_v36 = vpop.xlane.xlu0 %119  ;;  %v192_v63 = vperm.slane %v132_v30, %v2065_v24  ;;  %v189_v28 = vperm.slane %v126_v31, %v2065_v24  ;;  %v935_v31 = vmul.f32 %v1890_v22, %v2060_v32 }
  0x85   :  { %v184_v61 = vperm.slane %v120_v36, %v2065_v24  ;;  %v2097_v36 = vadd.s32 4294967272, %v2065_v24 }
  0x88   :  { %721 = vadd.xlane.f32.xlu2 %v720_v42  ;;  %718 = vadd.xlane.f32.xlu1 %v717_v43 }
  0x89   :  { %547 = vadd.xlane.f32.xlu0 %v546_v48  ;;  %v845_v48 = vadd.f32 %v809_v11, %v808_v55  ;;  %v933_v11 = vmul.f32 %v1816_v45, %v2060_v32 }
  0x8b   :  { %v135_v8 = vpop.xlane.xlu2 %134  ;;  %v129_v34 = vpop.xlane.xlu1 %128 }
  0x8c   :  { %v193_v25 = vperm.slane %v135_v8, %v2072_v53  ;;  %v190_v42 = vperm.slane %v129_v34, %v2072_v53  ;;  %v123_v43 = vpop.xlane.xlu0 %122 }
  0x8d   :  { %v186_v9 = vperm.slane %v123_v43, %v2072_v53  ;;  %v2116_v43 = vld [vmem:[%s3009_s1 + $0xd0] sm:$0xff] }
  0x8e   :  { %v194_v30 = vsel %vm187_vm0, %v193_v25, %v192_v63  ;;  %v191_v17 = vsel %vm187_vm0, %v190_v42, %v189_v28  ;;  %v970_v28 = vadd.f32 %v936_v27, %v935_v31  ;;  %v967_v25 = vadd.f32 %v934_v13, %v933_v11  ;;  %3072 = vst [vmem:[#allocation20_spill] sm:$0xff] %v2116_v43 }
  0x8f   :  { %v188_v26 = vsel %vm187_vm0, %v186_v9, %v184_v61  ;;  %v2104_v9 = vadd.s32 4294967280, %v2065_v24  ;;  %v931_v61 = vmul.f32 %v1826_v47, %v2060_v32  ;;  %v249_v27 = vmul.f32 %v1722_v41, %v1974_v29 }
  0x90   :  { %v211_v55 = vsel %vm210_vm1, %v191_v17, %v188_v26  ;;  %962 = vadd.xlane.f32.xlu2 %v961_v20  ;;  %846 = vadd.xlane.f32.xlu1 %v845_v48  ;;  %v932_v17 = vmul.f32 %v1831_v49, %v2063_v35  ;;  %v2121_v48 = vld [vmem:[%s3009_s1 + $0xd8] sm:$0xff]  ;;  %v2131_v26 = vld [vmem:[%s3009_s1 + $0xc8] sm:$0xff]  ;;  %v112_v11 = vmul.f32 %v1652_v16, %v2116_v43 }
  0x91   :  { %843 = vadd.xlane.f32.xlu0 %v842_v33  ;;  %v213_v18 = vsel %vm212_vm2, %v194_v30, %v211_v55  ;;  %3073 = vst [vmem:[#allocation21_spill] sm:$0xff] %v2121_v48  ;;  %v2126_v30 = vld [vmem:[%s3009_s1 + $0xc0] sm:$0xff]  ;;  %v250_v55 = vmul.f32 %v1725_v44, %v1979_v52  ;;  %v113_v13 = vmul.f32 %v1665_v19, %v2121_v48 }
  0x92   :  { %v964_v42 = vadd.f32 %v932_v17, %v931_v61  ;;  %v110_v61 = vmul.f32 %v1652_v16, %v2126_v30  ;;  %v111_v17 = vmul.f32 %v1665_v19, %v2131_v26  ;;  %v382_v19 = vmul.f32 %v1772_v1, %v1862_v3 }
  0x93   :  { %v269_v63 = vpop.xlane.xlu2 %268  ;;  %v266_v8 = vpop.xlane.xlu1 %265  ;;  %v291_v43 = vadd.f32 %v250_v55, %v249_v27  ;;  %v157_v52 = vadd.f32 %v113_v13, %v112_v11  ;;  %v380_v27 = vmul.f32 %v1772_v1, %v1872_v6  ;;  %v381_v55 = vmul.f32 %v1775_v4, %v1877_v7 }
  0x94   :  { %v328_v34 = vperm.slane %v266_v8, %v2097_v36  ;;  %v263_v20 = vpop.xlane.xlu0 %262  ;;  %v331_v8 = vperm.slane %v269_v63, %v2104_v9  ;;  %v154_v48 = vadd.f32 %v111_v17, %v110_v61  ;;  %v2172_v17 = vld [vmem:[%s3009_s1 + $0x180] sm:$0xff] }
  0x95   :  { %v326_v33 = vperm.slane %v263_v20, %v2104_v9 }
  0x97   :  { %v330_v31 = vsel %vm329_vm3, %v328_v34, %v326_v33 }
  0x98   :  { %971 = vadd.xlane.f32.xlu2 %v970_v28  ;;  %968 = vadd.xlane.f32.xlu1 %v967_v25 }
  0x99   :  { %965 = vadd.xlane.f32.xlu0 %v964_v42 }
  0x9b   :  { %v141_v34 = vpop.xlane.xlu2 %140  ;;  %v138_v20 = vpop.xlane.xlu1 %137 }
  0x9c   :  { %v196_v28 = vperm.slane %v141_v34, %v2072_v53  ;;  %v195_v25 = vperm.slane %v138_v20, %v2065_v24  ;;  %v272_v33 = vpop.xlane.xlu0 %271  ;;  %v383_v34 = vmul.f32 %v1775_v4, %v1867_v5 }
  0x9d   :  { %v332_v42 = vperm.slane %v272_v33, %v2097_v36 }
  0x9e   :  { %v197_v29 = vsel %vm187_vm0, %v196_v28, %v195_v25  ;;  %v2181_v25 = vadd.s32 4294967264, %v2065_v24 }
  0x9f   :  { %v2152_v16 = vsel %vm214_vm4, %v197_v29, %v213_v18  ;;  %v333_v63 = vsel %vm329_vm3, %v332_v42, %v331_v8  ;;  %v251_v29 = vmul.f32 %v1722_v41, %v1996_v0  ;;  %v252_v18 = vmul.f32 %v1725_v44, %v2001_v2 }
  0xa0   :  { %v352_v20 = vsel %vm210_vm1, %v333_v63, %v330_v31  ;;  %292 = vadd.xlane.f32.xlu2 %v291_v43  ;;  %158 = vadd.xlane.f32.xlu1 %v157_v52  ;;  %v423_v43 = vadd.f32 %v383_v34, %v382_v19  ;;  %v420_v52 = vadd.f32 %v381_v55, %v380_v27  ;;  %v2192_v34 = vadd.s32 4294967256, %v2065_v24 }
  0xa1   :  { %155 = vadd.xlane.f32.xlu0 %v154_v48  ;;  %v2177_v48 = vld [vmem:[%s3009_s1 + $0x188] sm:$0xff]  ;;  %v294_v28 = vadd.f32 %v252_v18, %v251_v29  ;;  %v683_v19 = vmul.f32 %v2172_v17, %v1808_v39  ;;  %v513_v27 = vmul.f32 %v1802_v37, %v1742_v54  ;;  %v514_v55 = vmul.f32 %v1805_v38, %v1747_v56 }
  0xa2   :  { %v684_v42 = vmul.f32 %v2177_v48, %v1811_v40  ;;  %v511_v29 = vmul.f32 %v1802_v37, %v1752_v57  ;;  %v512_v18 = vmul.f32 %v1805_v38, %v1757_v58  ;;  %v2210_v58 = vld [vmem:[%s3009_s1 + $0x190] sm:$0xff] }
  0xa3   :  { %v398_v11 = vpop.xlane.xlu2 %397  ;;  %v278_v13 = vpop.xlane.xlu1 %277  ;;  %3074 = vst [vmem:[#allocation22_spill] sm:$0xff] %v2210_v58 }
  0xa4   :  { %v335_v61 = vperm.slane %v278_v13, %v2097_v36  ;;  %v275_v31 = vpop.xlane.xlu0 %274 }
  0xa5   :  { %v334_v8 = vperm.slane %v275_v31, %v2104_v9 }
  0xa7   :  { %v336_v33 = vsel %vm329_vm3, %v335_v61, %v334_v8  ;;  %v552_v8 = vadd.f32 %v514_v55, %v513_v27  ;;  %v810_v55 = vmul.f32 %v2040_v62, %v1944_v21 }
  0xa8   :  { %v2189_v63 = vsel %vm212_vm2, %v336_v33, %v352_v20  ;;  %424 = vadd.xlane.f32.xlu2 %v423_v43  ;;  %421 = vadd.xlane.f32.xlu1 %v420_v52  ;;  %v461_v20 = vperm.slane %v398_v11, %v2181_v25  ;;  %v723_v52 = vadd.f32 %v684_v42, %v683_v19  ;;  %v2215_v11 = vld [vmem:[%s3009_s1 + $0x198] sm:$0xff] }
  0xa9   :  { %295 = vadd.xlane.f32.xlu0 %v294_v28  ;;  %v549_v28 = vadd.f32 %v512_v18, %v511_v29  ;;  %3075 = vst [vmem:[#allocation23_spill] sm:$0xff] %v2215_v11  ;;  %v812_v19 = vmul.f32 %v2030_v59, %v1944_v21  ;;  %v813_v42 = vmul.f32 %v2035_v60, %v1947_v14 }
  0xaa   :  { %v811_v29 = vmul.f32 %v2045_v15, %v1947_v14  ;;  %v685_v18 = vmul.f32 %v2210_v58, %v1808_v39 }
  0xab   :  { %v407_v13 = vpop.xlane.xlu2 %406  ;;  %v404_v61 = vpop.xlane.xlu1 %403 }
  0xac   :  { %v467_v31 = vperm.slane %v407_v13, %v2192_v34  ;;  %v466_v43 = vperm.slane %v404_v61, %v2181_v25  ;;  %v401_v54 = vpop.xlane.xlu0 %400 }
  0xad   :  { %v463_v56 = vperm.slane %v401_v54, %v2192_v34 }
  0xae   :  { %v468_v57 = vsel %vm464_vm5, %v467_v31, %v466_v43  ;;  %v2234_v31 = vperm.slane %v1627_v10, 7 }
  0xaf   :  { %v465_v33 = vsel %vm464_vm5, %v463_v56, %v461_v20  ;;  %v686_v20 = vmul.f32 %v2215_v11, %v1811_v40  ;;  %v2238_v56 = vperm.slane %v1634_v12, 7 }
  0xb0   :  { %v2223_v27 = vsel %vm210_vm1, %v468_v57, %v465_v33  ;;  %724 = vadd.xlane.f32.xlu2 %v723_v52  ;;  %553 = vadd.xlane.f32.xlu1 %v552_v8  ;;  %v851_v52 = vadd.f32 %v813_v42, %v812_v19  ;;  %v848_v8 = vadd.f32 %v811_v29, %v810_v55  ;;  %v3077_v42 = vld [vmem:[#allocation11_spill] sm:$0xff]  ;;  %v3078_v55 = vld [vmem:[#allocation8_spill] sm:$0xff] }
  0xb1   :  { %550 = vadd.xlane.f32.xlu0 %v549_v28  ;;  %v726_v57 = vadd.f32 %v686_v20, %v685_v18  ;;  %v1060_v15 = vmul.f32 %v1836_v50, %v2234_v31  ;;  %v1061_v10 = vmul.f32 %v1841_v51, %v2238_v56  ;;  %v940_v12 = vmul.f32 %v3077_v42, %v2063_v35  ;;  %v3079_v18 = vld [vmem:[#allocation9_spill] sm:$0xff] }
  0xb2   :  { %v937_v29 = vmul.f32 %v3078_v55, %v2060_v32  ;;  %v938_v20 = vmul.f32 %v3079_v18, %v2063_v35  ;;  %v1066_v35 = vmul.f32 %v1890_v22, %v2234_v31  ;;  %v1063_v22 = vmul.f32 %v1831_v49, %v2238_v56  ;;  %v2294_v49 = vld [vmem:[%s3009_s1 + $0xe0] sm:$0xff] }
  0xb3   :  { %v707_v13 = vpop.xlane.xlu2 %706  ;;  %v704_v61 = vpop.xlane.xlu1 %703 }
  0xb4   :  { %v764_v43 = vperm.slane %v704_v61, %v2072_v53  ;;  %v701_v54 = vpop.xlane.xlu0 %700  ;;  %v3076_v61 = vld [vmem:[#allocation10_spill] sm:$0xff]  ;;  %v766_v50 = vperm.slane %v707_v13, %v2065_v24  ;;  %v973_v42 = vadd.f32 %v938_v20, %v937_v29 }
  0xb5   :  { %v763_v28 = vperm.slane %v701_v54, %v2065_v24  ;;  %v939_v19 = vmul.f32 %v3076_v61, %v2060_v32 }
  0xb7   :  { %v765_v33 = vsel %vm187_vm0, %v764_v43, %v763_v28  ;;  %v1092_v28 = vadd.f32 %v1061_v10, %v1060_v15  ;;  %v976_v61 = vadd.f32 %v940_v12, %v939_v19  ;;  %v1064_v10 = vmul.f32 %v1816_v45, %v2234_v31 }
  0xb8   :  { %852 = vadd.xlane.f32.xlu2 %v851_v52  ;;  %849 = vadd.xlane.f32.xlu1 %v848_v8 }
  0xb9   :  { %727 = vadd.xlane.f32.xlu0 %v726_v57 }
  0xbb   :  { %v147_v43 = vpop.xlane.xlu2 %146  ;;  %v144_v54 = vpop.xlane.xlu1 %143 }
  0xbc   :  { %v199_v51 = vperm.slane %v147_v43, %v2072_v53  ;;  %v198_v52 = vperm.slane %v144_v54, %v2065_v24  ;;  %v710_v8 = vpop.xlane.xlu0 %709  ;;  %v1067_v43 = vmul.f32 %v1895_v23, %v2238_v56  ;;  %v253_v54 = vmul.f32 %v1722_v41, %v2126_v30 }
  0xbd   :  { %v767_v57 = vperm.slane %v710_v8, %v2072_v53  ;;  %v2314_v8 = vadd.s32 4294967248, %v2065_v24 }
  0xbe   :  { %v200_v62 = vsel %vm187_vm0, %v199_v51, %v198_v52  ;;  %v1101_v29 = vadd.f32 %v1067_v43, %v1066_v35  ;;  %v2299_v35 = vld [vmem:[%s3009_s1 + $0xe8] sm:$0xff]  ;;  %v254_v51 = vmul.f32 %v1725_v44, %v2131_v26 }
  0xbf   :  { %v2261_v60 = vsel %vm216_vm6, %v200_v62, %v2152_v16  ;;  %v768_v13 = vsel %vm187_vm0, %v767_v57, %v766_v50  ;;  %v1065_v16 = vmul.f32 %v1821_v46, %v2238_v56  ;;  %v1062_v62 = vmul.f32 %v1826_v47, %v2234_v31  ;;  %v2284_v46 = vld [vmem:[%s3009_s1 + $0xf0] sm:$0xff]  ;;  %v2289_v47 = vld [vmem:[%s3009_s1 + $0xf8] sm:$0xff] }
  0xc0   :  { %v2269_v15 = vsel %vm210_vm1, %v768_v13, %v765_v33  ;;  %1093 = vadd.xlane.f32.xlu2 %v1092_v28  ;;  %977 = vadd.xlane.f32.xlu1 %v976_v61  ;;  %v2303_v50 = vadd.s32 4294967240, %v2065_v24  ;;  %v3080_v28 = vld [vmem:[#allocation6_spill] sm:$0xff]  ;;  %v3081_v13 = vld [vmem:[#allocation7_spill] sm:$0xff] }
  0xc1   :  { %974 = vadd.xlane.f32.xlu0 %v973_v42  ;;  %v1098_v61 = vadd.f32 %v1065_v16, %v1064_v10  ;;  %v1095_v45 = vadd.f32 %v1063_v22, %v1062_v62  ;;  %v116_v57 = vmul.f32 %v3080_v28, %v2284_v46  ;;  %v117_v43 = vmul.f32 %v3081_v13, %v2289_v47 }
  0xc2   :  { %v114_v10 = vmul.f32 %v3080_v28, %v2294_v49  ;;  %v115_v16 = vmul.f32 %v3081_v13, %v2299_v35  ;;  %v387_v13 = vmul.f32 %v1775_v4, %v2001_v2 }
  0xc3   :  { %v410_v19 = vpop.xlane.xlu2 %409  ;;  %v284_v23 = vpop.xlane.xlu1 %283 }
  0xc4   :  { %v338_v33 = vperm.slane %v284_v23, %v2097_v36  ;;  %v281_v12 = vpop.xlane.xlu0 %280 }
  0xc5   :  { %v337_v20 = vperm.slane %v281_v12, %v2104_v9 }
  0xc7   :  { %v339_v42 = vsel %vm329_vm3, %v338_v33, %v337_v20 }
  0xc8   :  { %v2311_v52 = vsel %vm214_vm4, %v339_v42, %v2189_v63  ;;  %1102 = vadd.xlane.f32.xlu2 %v1101_v29  ;;  %1099 = vadd.xlane.f32.xlu1 %v1098_v61  ;;  %v469_v63 = vperm.slane %v410_v19, %v2181_v25  ;;  %v297_v29 = vadd.f32 %v254_v51, %v253_v54  ;;  %v3082_v54 = vld [vmem:[#allocation12_spill] sm:$0xff] }
  0xc9   :  { %1096 = vadd.xlane.f32.xlu0 %v1095_v45  ;;  %v163_v61 = vadd.f32 %v117_v43, %v116_v57  ;;  %v160_v45 = vadd.f32 %v115_v16, %v114_v10  ;;  %v386_v19 = vmul.f32 %v1772_v1, %v1996_v0  ;;  %v384_v51 = vmul.f32 %v1772_v1, %v3082_v54  ;;  %v3083_v57 = vld [vmem:[#allocation13_spill] sm:$0xff]  ;;  %v3084_v10 = vld [vmem:[#allocation20_spill] sm:$0xff] }
  0xca   :  { %v385_v43 = vmul.f32 %v1775_v4, %v3083_v57  ;;  %v255_v16 = vmul.f32 %v1722_v41, %v3084_v10 }
  0xcb   :  { %v536_v62 = vpop.xlane.xlu2 %535  ;;  %v533_v22 = vpop.xlane.xlu1 %532 }
  0xcc   :  { %v598_v23 = vperm.slane %v536_v62, %v2303_v50  ;;  %v596_v33 = vperm.slane %v533_v22, %v2314_v8  ;;  %v413_v12 = vpop.xlane.xlu0 %412 }
  0xcd   :  { %v470_v20 = vperm.slane %v413_v12, %v2192_v34 }
  0xce   :  { %v600_v42 = vsel %vm599_vm7, %v598_v23, %v596_v33 }
  0xcf   :  { %v471_v28 = vsel %vm464_vm5, %v470_v20, %v469_v63  ;;  %v3085_v63 = vld [vmem:[#allocation21_spill] sm:$0xff]  ;;  %v2350_v20 = vld [vmem:[%s3009_s1 + $0x1a0] sm:$0xff] }
  0xd0   :  { %v2336_v62 = vsel %vm212_vm2, %v471_v28, %v2223_v27  ;;  %298 = vadd.xlane.f32.xlu2 %v297_v29  ;;  %164 = vadd.xlane.f32.xlu1 %v163_v61  ;;  %v256_v22 = vmul.f32 %v1725_v44, %v3085_v63  ;;  %v429_v29 = vadd.f32 %v387_v13, %v386_v19 }
  0xd1   :  { %161 = vadd.xlane.f32.xlu0 %v160_v45  ;;  %v426_v61 = vadd.f32 %v385_v43, %v384_v51  ;;  %v2355_v45 = vld [vmem:[%s3009_s1 + $0x1a8] sm:$0xff]  ;;  %v517_v51 = vmul.f32 %v1802_v37, %v1862_v3  ;;  %v518_v43 = vmul.f32 %v1805_v38, %v1867_v5 }
  0xd2   :  { %3086 = vst [vmem:[#allocation8_spill] sm:$0xff] %v2355_v45  ;;  %v300_v2 = vadd.f32 %v256_v22, %v255_v16  ;;  %v688_v19 = vmul.f32 %v2355_v45, %v1811_v40  ;;  %v515_v16 = vmul.f32 %v1802_v37, %v1872_v6  ;;  %v516_v22 = vmul.f32 %v1805_v38, %v1877_v7  ;;  %v2382_v6 = vld [vmem:[%s3009_s1 + $0x1b0] sm:$0xff]  ;;  %v2387_v7 = vld [vmem:[%s3009_s1 + $0x1b8] sm:$0xff] }
  0xd3   :  { %v713_v23 = vpop.xlane.xlu2 %712  ;;  %v542_v33 = vpop.xlane.xlu1 %541  ;;  %3087 = vst [vmem:[#allocation9_spill] sm:$0xff] %v2387_v7 }
  0xd4   :  { %v602_v27 = vperm.slane %v542_v33, %v2303_v50  ;;  %v539_v12 = vpop.xlane.xlu0 %538  ;;  %v687_v33 = vmul.f32 %v2350_v20, %v1808_v39 }
  0xd5   :  { %v601_v28 = vperm.slane %v539_v12, %v2314_v8 }
  0xd6   :  { %v729_v3 = vadd.f32 %v688_v19, %v687_v33  ;;  %v816_v33 = vmul.f32 %v2210_v58, %v1944_v21  ;;  %v817_v19 = vmul.f32 %v2215_v11, %v1947_v14 }
  0xd7   :  { %v603_v0 = vsel %vm599_vm7, %v602_v27, %v601_v28  ;;  %v769_v27 = vperm.slane %v713_v23, %v2065_v24  ;;  %v558_v28 = vadd.f32 %v518_v43, %v517_v51  ;;  %v814_v43 = vmul.f32 %v2172_v17, %v1944_v21 }
  0xd8   :  { %v2364_v13 = vsel %vm210_vm1, %v603_v0, %v600_v42  ;;  %430 = vadd.xlane.f32.xlu2 %v429_v29  ;;  %427 = vadd.xlane.f32.xlu1 %v426_v61 }
  0xd9   :  { %301 = vadd.xlane.f32.xlu0 %v300_v2  ;;  %v555_v2 = vadd.f32 %v516_v22, %v515_v16  ;;  %v815_v16 = vmul.f32 %v2177_v48, %v1947_v14  ;;  %v689_v22 = vmul.f32 %v2382_v6, %v1808_v39 }
  0xdb   :  { %v835_v12 = vpop.xlane.xlu2 %834  ;;  %v832_v0 = vpop.xlane.xlu1 %831 }
  0xdc   :  { %v895_v42 = vperm.slane %v835_v12, %v2097_v36  ;;  %v894_v29 = vperm.slane %v832_v0, %v2104_v9  ;;  %v716_v61 = vpop.xlane.xlu0 %715 }
  0xdd   :  { %v770_v5 = vperm.slane %v716_v61, %v2072_v53  ;;  %v854_v61 = vadd.f32 %v815_v16, %v814_v43  ;;  %v3089_v43 = vld [vmem:[#allocation16_spill] sm:$0xff] }
  0xde   :  { %v896_v45 = vsel %vm329_vm3, %v895_v42, %v894_v29  ;;  %v857_v29 = vadd.f32 %v817_v19, %v816_v33  ;;  %v943_v33 = vmul.f32 %v2030_v59, %v2060_v32  ;;  %v3088_v19 = vld [vmem:[#allocation19_spill] sm:$0xff] }
  0xdf   :  { %v771_v23 = vsel %vm187_vm0, %v770_v5, %v769_v27  ;;  %v690_v27 = vmul.f32 %v2387_v7, %v1811_v40  ;;  %v944_v16 = vmul.f32 %v3089_v43, %v3088_v19 }
  0xe0   :  { %v2396_v51 = vsel %vm212_vm2, %v771_v23, %v2269_v15  ;;  %730 = vadd.xlane.f32.xlu2 %v729_v3  ;;  %559 = vadd.xlane.f32.xlu1 %v558_v28  ;;  %v1069_v23 = vmul.f32 %v3079_v18, %v2238_v56 }
  0xe1   :  { %556 = vadd.xlane.f32.xlu0 %v555_v2  ;;  %v732_v28 = vadd.f32 %v690_v27, %v689_v22  ;;  %v1068_v2 = vmul.f32 %v3078_v55, %v2234_v31  ;;  %v3090_v22 = vld [vmem:[#allocation17_spill] sm:$0xff]  ;;  %v3091_v55 = vld [vmem:[#allocation18_spill] sm:$0xff] }
  0xe2   :  { %v941_v27 = vmul.f32 %v3090_v22, %v2060_v32 }
  0xe3   :  { %v150_v12 = vpop.xlane.xlu2 %149  ;;  %v841_v0 = vpop.xlane.xlu1 %840 }
  0xe4   :  { %v898_v15 = vperm.slane %v841_v0, %v2097_v36  ;;  %v838_v42 = vpop.xlane.xlu0 %837  ;;  %v942_v0 = vmul.f32 %v3091_v55, %v3088_v19  ;;  %v201_v18 = vperm.slane %v150_v12, %v2065_v24 }
  0xe5   :  { %v897_v3 = vperm.slane %v838_v42, %v2104_v9 }
  0xe6   :  { %v979_v58 = vadd.f32 %v942_v0, %v941_v27 }
  0xe7   :  { %v899_v5 = vsel %vm329_vm3, %v898_v15, %v897_v3  ;;  %v1104_v3 = vadd.f32 %v1069_v23, %v1068_v2  ;;  %v257_v23 = vmul.f32 %v1722_v41, %v2294_v49 }
  0xe8   :  { %v2414_v11 = vsel %vm210_vm1, %v899_v5, %v896_v45  ;;  %858 = vadd.xlane.f32.xlu2 %v857_v29  ;;  %855 = vadd.xlane.f32.xlu1 %v854_v61  ;;  %v982_v5 = vadd.f32 %v944_v16, %v943_v33  ;;  %v3093_v33 = vld [vmem:[#allocation10_spill] sm:$0xff] }
  0xe9   :  { %733 = vadd.xlane.f32.xlu0 %v732_v28  ;;  %v1070_v16 = vmul.f32 %v3093_v33, %v2234_v31 }
  0xeb   :  { %v290_v15 = vpop.xlane.xlu2 %289  ;;  %v287_v45 = vpop.xlane.xlu1 %286 }
  0xec   :  { %v341_v42 = vperm.slane %v290_v15, %v2097_v36  ;;  %v340_v29 = vperm.slane %v287_v45, %v2104_v9  ;;  %v153_v61 = vpop.xlane.xlu0 %152  ;;  %v259_v15 = vmul.f32 %v1722_v41, %v2284_v46  ;;  %v260_v45 = vmul.f32 %v1725_v44, %v2289_v47 }
  0xed   :  { %v202_v28 = vperm.slane %v153_v61, %v2072_v53 }
  0xee   :  { %v342_v22 = vsel %vm329_vm3, %v341_v42, %v340_v29  ;;  %v306_v29 = vadd.f32 %v260_v45, %v259_v15  ;;  %v391_v15 = vmul.f32 %v1775_v4, %v3085_v63  ;;  %v388_v45 = vmul.f32 %v1772_v1, %v2126_v30 }
  0xef   :  { %v2431_v55 = vsel %vm216_vm6, %v342_v22, %v2311_v52  ;;  %v203_v12 = vsel %vm187_vm0, %v202_v28, %v201_v18  ;;  %v258_v52 = vmul.f32 %v1725_v44, %v2299_v35  ;;  %v3094_v22 = vld [vmem:[#allocation11_spill] sm:$0xff]  ;;  %v519_v44 = vmul.f32 %v1802_v37, %v3082_v54 }
  0xf0   :  { %v2440_v2 = vsel %vm218_vm8, %v203_v12, %v2261_v60  ;;  %1105 = vadd.xlane.f32.xlu2 %v1104_v3  ;;  %983 = vadd.xlane.f32.xlu1 %v982_v5  ;;  %v1071_v27 = vmul.f32 %v3094_v22, %v2238_v56  ;;  %v390_v12 = vmul.f32 %v1772_v1, %v3084_v10 }
  0xf1   :  { %3092 = vst [vmem:[#allocation6_spill] sm:$0xff] %v2440_v2  ;;  %980 = vadd.xlane.f32.xlu0 %v979_v58  ;;  %v303_v61 = vadd.f32 %v258_v52, %v257_v23  ;;  %v520_v58 = vmul.f32 %v1805_v38, %v3083_v57  ;;  %v389_v54 = vmul.f32 %v1775_v4, %v2131_v26 }
  0xf2   :  { %v1107_v41 = vadd.f32 %v1071_v27, %v1070_v16  ;;  %v435_v27 = vadd.f32 %v391_v15, %v390_v12 }
  0xf3   :  { %v545_v0 = vpop.xlane.xlu2 %544  ;;  %v419_v18 = vpop.xlane.xlu1 %418  ;;  %v561_v22 = vadd.f32 %v520_v58, %v519_v44 }
  0xf4   :  { %v473_v60 = vperm.slane %v419_v18, %v2192_v34  ;;  %v416_v42 = vpop.xlane.xlu0 %415  ;;  %v604_v57 = vperm.slane %v545_v0, %v2314_v8  ;;  %v2475_v18 = vld [vmem:[%s3009_s1 + $0x1d0] sm:$0xff] }
  0xf5   :  { %v472_v3 = vperm.slane %v416_v42, %v2181_v25  ;;  %v432_v42 = vadd.f32 %v389_v54, %v388_v45  ;;  %v693_v44 = vmul.f32 %v2475_v18, %v1808_v39  ;;  %v3095_v45 = vld [vmem:[#allocation14_spill] sm:$0xff] }
  0xf6   :  { %v521_v54 = vmul.f32 %v1802_v37, %v3095_v45 }
  0xf7   :  { %v474_v5 = vsel %vm464_vm5, %v473_v60, %v472_v3  ;;  %v2480_v60 = vld [vmem:[%s3009_s1 + $0x1d8] sm:$0xff] }
  0xf8   :  { %v2459_v28 = vsel %vm214_vm4, %v474_v5, %v2336_v62  ;;  %307 = vadd.xlane.f32.xlu2 %v306_v29  ;;  %304 = vadd.xlane.f32.xlu1 %v303_v61  ;;  %v2486_v29 = vld [vmem:[%s3009_s1 + $0x1c0] sm:$0xff]  ;;  %v2491_v61 = vld [vmem:[%s3009_s1 + $0x1c8] sm:$0xff]  ;;  %v694_v58 = vmul.f32 %v2480_v60, %v1811_v40 }
  0xf9   :  { %1108 = vadd.xlane.f32.xlu0 %v1107_v41  ;;  %v691_v15 = vmul.f32 %v2486_v29, %v1808_v39 }
  0xfb   :  { %v722_v23 = vpop.xlane.xlu2 %721  ;;  %v719_v62 = vpop.xlane.xlu1 %718 }
  0xfc   :  { %v773_v52 = vperm.slane %v722_v23, %v2072_v53  ;;  %v772_v33 = vperm.slane %v719_v62, %v2065_v24  ;;  %v548_v16 = vpop.xlane.xlu0 %547 }
  0xfd   :  { %v605_v0 = vperm.slane %v548_v16, %v2303_v50  ;;  %v738_v16 = vadd.f32 %v694_v58, %v693_v44  ;;  %v820_v44 = vmul.f32 %v2382_v6, %v1944_v21  ;;  %v821_v58 = vmul.f32 %v2387_v7, %v1947_v14 }
  0xfe   :  { %v774_v3 = vsel %vm187_vm0, %v773_v52, %v772_v33  ;;  %v1074_v7 = vmul.f32 %v2030_v59, %v2234_v31  ;;  %v3101_v59 = vld [vmem:[#allocation23_spill] sm:$0xff] }
  0xff   :  { %v2496_v41 = vsel %vm214_vm4, %v774_v3, %v2396_v51  ;;  %v606_v5 = vsel %vm599_vm7, %v605_v0, %v604_v57  ;;  %v692_v51 = vmul.f32 %v2491_v61, %v1811_v40  ;;  %v3096_v57 = vld [vmem:[#allocation15_spill] sm:$0xff] }
 0x100   :  { %v2505_v12 = vsel %vm212_vm2, %v606_v5, %v2364_v13  ;;  %562 = vadd.xlane.f32.xlu2 %v561_v22  ;;  %436 = vadd.xlane.f32.xlu1 %v435_v27  ;;  %v522_v23 = vmul.f32 %v1805_v38, %v3096_v57  ;;  %v946_v5 = vmul.f32 %v2177_v48, %v3088_v19 }
 0x101   :  { %433 = vadd.xlane.f32.xlu0 %v432_v42  ;;  %v735_v22 = vadd.f32 %v692_v51, %v691_v15  ;;  %v945_v42 = vmul.f32 %v2172_v17, %v2060_v32  ;;  %v818_v15 = vmul.f32 %v2350_v20, %v1944_v21  ;;  %v3097_v51 = vld [vmem:[#allocation8_spill] sm:$0xff] }
 0x102   :  { %v564_v0 = vadd.f32 %v522_v23, %v521_v54  ;;  %v819_v54 = vmul.f32 %v3097_v51, %v1947_v14 }
 0x103   :  { %v963_v62 = vpop.xlane.xlu2 %962  ;;  %v847_v52 = vpop.xlane.xlu1 %846 }
 0x104   :  { %v901_v13 = vperm.slane %v847_v52, %v2097_v36  ;;  %v844_v33 = vpop.xlane.xlu0 %843  ;;  %v1025_v57 = vperm.slane %v963_v62, %v2181_v25  ;;  %v1075_v62 = vmul.f32 %v3089_v43, %v2238_v56 }
 0x105   :  { %v900_v27 = vperm.slane %v844_v33, %v2104_v9 }
 0x107   :  { %v902_v3 = vsel %vm329_vm3, %v901_v13, %v900_v27 }
 0x108   :  { %v2524_v45 = vsel %vm212_vm2, %v902_v3, %v2414_v11  ;;  %739 = vadd.xlane.f32.xlu2 %v738_v16  ;;  %736 = vadd.xlane.f32.xlu1 %v735_v22  ;;  %v985_v16 = vadd.f32 %v946_v5, %v945_v42  ;;  %v863_v22 = vadd.f32 %v821_v58, %v820_v44  ;;  %v3098_v42 = vld [vmem:[#allocation17_spill] sm:$0xff]  ;;  %v3099_v44 = vld [vmem:[#allocation18_spill] sm:$0xff] }
 0x109   :  { %565 = vadd.xlane.f32.xlu0 %v564_v0  ;;  %v860_v0 = vadd.f32 %v819_v54, %v818_v15  ;;  %v1072_v5 = vmul.f32 %v3098_v42, %v2234_v31  ;;  %v1073_v58 = vmul.f32 %v3099_v44, %v2238_v56  ;;  %v3100_v15 = vld [vmem:[#allocation22_spill] sm:$0xff] }
 0x10a   :  { %v947_v54 = vmul.f32 %v3100_v15, %v2060_v32 }
 0x10b   :  { %v972_v23 = vpop.xlane.xlu2 %971  ;;  %v969_v11 = vpop.xlane.xlu1 %968 }
 0x10c   :  { %v1029_v52 = vperm.slane %v972_v23, %v2192_v34  ;;  %v1028_v13 = vperm.slane %v969_v11, %v2181_v25  ;;  %v966_v33 = vpop.xlane.xlu0 %965 }
 0x10d   :  { %v1026_v27 = vperm.slane %v966_v33, %v2192_v34 }
 0x10e   :  { %v1030_v3 = vsel %vm464_vm5, %v1029_v52, %v1028_v13  ;;  %v1113_v52 = vadd.f32 %v1075_v62, %v1074_v7  ;;  %v1110_v13 = vadd.f32 %v1073_v58, %v1072_v5  ;;  %v392_v7 = vmul.f32 %v1772_v1, %v2294_v49 }
 0x10f   :  { %v1027_v2 = vsel %vm464_vm5, %v1026_v27, %v1025_v57  ;;  %v948_v57 = vmul.f32 %v3101_v59, %v3088_v19  ;;  %v394_v27 = vmul.f32 %v1772_v1, %v2284_v46  ;;  %v2582_v1 = vld [vmem:[%s3009_s1 + $0x1f8] sm:$0xff] }
 0x110   :  { %v2545_v23 = vsel %vm210_vm1, %v1030_v3, %v1027_v2  ;;  %986 = vadd.xlane.f32.xlu2 %v985_v16  ;;  %864 = vadd.xlane.f32.xlu1 %v863_v22  ;;  %v523_v16 = vmul.f32 %v1802_v37, %v2126_v30  ;;  %v524_v22 = vmul.f32 %v1805_v38, %v2131_v26 }
 0x111   :  { %861 = vadd.xlane.f32.xlu0 %v860_v0  ;;  %v988_v33 = vadd.f32 %v948_v57, %v947_v54  ;;  %v395_v0 = vmul.f32 %v1775_v4, %v2289_v47  ;;  %v393_v3 = vmul.f32 %v1775_v4, %v2299_v35  ;;  %v2577_v57 = vld [vmem:[%s3009_s1 + $0x1f0] sm:$0xff] }
 0x112   :  { %v567_v58 = vadd.f32 %v524_v22, %v523_v16 }
 0x113   :  { %v293_v11 = vpop.xlane.xlu2 %292  ;;  %v2555_v43 = vpop.xlane.xlu1 %158  ;;  %v441_v54 = vadd.f32 %v395_v0, %v394_v27  ;;  %v697_v27 = vmul.f32 %v2577_v57, %v1808_v39  ;;  %v698_v0 = vmul.f32 %v2582_v1, %v1811_v40 }
 0x114   :  { %v2557_v2 = vpop.xlane.xlu0 %155  ;;  %v343_v30 = vperm.slane %v293_v11, %v2104_v9  ;;  %v438_v11 = vadd.f32 %v393_v3, %v392_v7 }
 0x118   :  { %1114 = vadd.xlane.f32.xlu2 %v1113_v52  ;;  %1111 = vadd.xlane.f32.xlu1 %v1110_v13  ;;  %v2588_v52 = vld [vmem:[%s3009_s1 + $0x1e0] sm:$0xff]  ;;  %v2593_v13 = vld [vmem:[%s3009_s1 + $0x1e8] sm:$0xff] }
 0x119   :  { %989 = vadd.xlane.f32.xlu0 %v988_v33  ;;  %v695_v3 = vmul.f32 %v2588_v52, %v1808_v39 }
 0x11b   :  { %v425_v62 = vpop.xlane.xlu2 %424  ;;  %v422_v42 = vpop.xlane.xlu1 %421 }
 0x11c   :  { %v476_v5 = vperm.slane %v425_v62, %v2192_v34  ;;  %v475_v26 = vperm.slane %v422_v42, %v2181_v25  ;;  %v296_v44 = vpop.xlane.xlu0 %295  ;;  %v526_v62 = vmul.f32 %v1805_v38, %v3085_v63 }
 0x11d   :  { %v344_v4 = vperm.slane %v296_v44, %v2097_v36  ;;  %v744_v44 = vadd.f32 %v698_v0, %v697_v27  ;;  %v823_v27 = vmul.f32 %v2491_v61, %v1947_v14 }
 0x11e   :  { %v477_v33 = vsel %vm464_vm5, %v476_v5, %v475_v26 }
 0x11f   :  { %v2598_v16 = vsel %vm216_vm6, %v477_v33, %v2459_v28  ;;  %v345_v22 = vsel %vm329_vm3, %v344_v4, %v343_v30  ;;  %v696_v28 = vmul.f32 %v2593_v13, %v1811_v40  ;;  %v525_v30 = vmul.f32 %v1802_v37, %v3084_v10 }
 0x120   :  { %v2607_v7 = vsel %vm218_vm8, %v345_v22, %v2431_v55  ;;  %568 = vadd.xlane.f32.xlu2 %v567_v58  ;;  %442 = vadd.xlane.f32.xlu1 %v441_v54  ;;  %v949_v40 = vmul.f32 %v2350_v20, %v2060_v32  ;;  %v950_v10 = vmul.f32 %v3097_v51, %v3088_v19 }
 0x121   :  { %439 = vadd.xlane.f32.xlu0 %v438_v11  ;;  %v741_v58 = vadd.f32 %v696_v28, %v695_v3  ;;  %v570_v39 = vadd.f32 %v526_v62, %v525_v30  ;;  %v824_v11 = vmul.f32 %v2475_v18, %v1944_v21  ;;  %v825_v33 = vmul.f32 %v2480_v60, %v1947_v14 }
 0x122   :  { %v822_v22 = vmul.f32 %v2486_v29, %v1944_v21 }
 0x123   :  { %v725_v42 = vpop.xlane.xlu2 %724  ;;  %v554_v5 = vpop.xlane.xlu1 %553 }
 0x124   :  { %v608_v55 = vperm.slane %v554_v5, %v2303_v50  ;;  %v551_v26 = vpop.xlane.xlu0 %550  ;;  %v775_v0 = vperm.slane %v725_v42, %v2065_v24  ;;  %v991_v5 = vadd.f32 %v950_v10, %v949_v40  ;;  %v1076_v10 = vmul.f32 %v2172_v17, %v2234_v31 }
 0x125   :  { %v607_v54 = vperm.slane %v551_v26, %v2314_v8 }
 0x127   :  { %v609_v4 = vsel %vm599_vm7, %v608_v55, %v607_v54  ;;  %v869_v55 = vadd.f32 %v825_v33, %v824_v11  ;;  %v951_v11 = vmul.f32 %v2382_v6, %v2060_v32 }
 0x128   :  { %v2626_v63 = vsel %vm214_vm4, %v609_v4, %v2505_v12  ;;  %745 = vadd.xlane.f32.xlu2 %v744_v44  ;;  %742 = vadd.xlane.f32.xlu1 %v741_v58  ;;  %v866_v44 = vadd.f32 %v823_v27, %v822_v22  ;;  %v1079_v4 = vmul.f32 %v3101_v59, %v2238_v56 }
 0x129   :  { %571 = vadd.xlane.f32.xlu0 %v570_v39  ;;  %v1078_v39 = vmul.f32 %v3100_v15, %v2234_v31  ;;  %v3102_v15 = vld [vmem:[#allocation9_spill] sm:$0xff] }
 0x12a   :  { %v952_v33 = vmul.f32 %v3102_v15, %v3088_v19 }
 0x12b   :  { %v853_v3 = vpop.xlane.xlu2 %852  ;;  %v850_v12 = vpop.xlane.xlu1 %849 }
 0x12c   :  { %v904_v28 = vperm.slane %v853_v3, %v2097_v36  ;;  %v903_v30 = vperm.slane %v850_v12, %v2104_v9  ;;  %v728_v62 = vpop.xlane.xlu0 %727  ;;  %v994_v17 = vadd.f32 %v952_v33, %v951_v11  ;;  %v955_v33 = vmul.f32 %v2475_v18, %v2060_v32 }
 0x12d   :  { %v776_v26 = vperm.slane %v728_v62, %v2072_v53 }
 0x12e   :  { %v905_v58 = vsel %vm329_vm3, %v904_v28, %v903_v30  ;;  %v827_v30 = vmul.f32 %v2593_v13, %v1947_v14 }
 0x12f   :  { %v2643_v54 = vsel %vm214_vm4, %v905_v58, %v2524_v45  ;;  %v777_v42 = vsel %vm187_vm0, %v776_v26, %v775_v0  ;;  %v1077_v45 = vmul.f32 %v2177_v48, %v2238_v56  ;;  %v1119_v0 = vadd.f32 %v1079_v4, %v1078_v39 }
 0x130   :  { %v2652_v40 = vsel %vm216_vm6, %v777_v42, %v2496_v41  ;;  %992 = vadd.xlane.f32.xlu2 %v991_v5  ;;  %870 = vadd.xlane.f32.xlu1 %v869_v55  ;;  %v826_v48 = vmul.f32 %v2588_v52, %v1944_v21  ;;  %v529_v5 = vmul.f32 %v1802_v37, %v2284_v46 }
 0x131   :  { %867 = vadd.xlane.f32.xlu0 %v866_v44  ;;  %v1116_v3 = vadd.f32 %v1077_v45, %v1076_v10  ;;  %v530_v55 = vmul.f32 %v1805_v38, %v2289_v47  ;;  %v527_v26 = vmul.f32 %v1802_v37, %v2294_v49  ;;  %v528_v44 = vmul.f32 %v1805_v38, %v2299_v35 }
 0x132   :  { %v872_v46 = vadd.f32 %v827_v30, %v826_v48  ;;  %v205_v37 = vperm.slane %v2555_v43, %v2072_v53  ;;  %v204_v38 = vperm.slane %v2557_v2, %v2065_v24  ;;  %v953_v43 = vmul.f32 %v2486_v29, %v2060_v32 }
 0x133   :  { %v1094_v59 = vpop.xlane.xlu2 %1093  ;;  %v978_v22 = vpop.xlane.xlu1 %977  ;;  %v576_v45 = vadd.f32 %v530_v55, %v529_v5  ;;  %v573_v11 = vadd.f32 %v528_v44, %v527_v26  ;;  %v828_v2 = vmul.f32 %v2577_v57, %v1944_v21  ;;  %v3103_v21 = vld [vmem:[#allocation6_spill] sm:$0xff]  ;;  %v957_v44 = vmul.f32 %v2588_v52, %v2060_v32 }
 0x134   :  { %v1032_v41 = vperm.slane %v978_v22, %v2192_v34  ;;  %v975_v27 = vpop.xlane.xlu0 %974  ;;  %v1156_v58 = vperm.slane %v1094_v59, %v2314_v8  ;;  %v956_v59 = vmul.f32 %v2480_v60, %v3088_v19 }
 0x135   :  { %v1031_v12 = vperm.slane %v975_v27, %v2181_v25  ;;  %v829_v27 = vmul.f32 %v2582_v1, %v1947_v14 }
 0x136   :  { %v1000_v48 = vadd.f32 %v956_v59, %v955_v33  ;;  %v1084_v33 = vmul.f32 %v2486_v29, %v2234_v31  ;;  %v1085_v59 = vmul.f32 %v2491_v61, %v2238_v56 }
 0x137   :  { %v1033_v28 = vsel %vm464_vm5, %v1032_v41, %v1031_v12  ;;  %v954_v41 = vmul.f32 %v2491_v61, %v3088_v19  ;;  %v206_v12 = vsel %vm187_vm0, %v205_v37, %v204_v38  ;;  %v875_v55 = vadd.f32 %v829_v27, %v828_v2 }
 0x138   :  { %v2671_v62 = vsel %vm212_vm2, %v1033_v28, %v2545_v23  ;;  %1120 = vadd.xlane.f32.xlu2 %v1119_v0  ;;  %1117 = vadd.xlane.f32.xlu1 %v1116_v3  ;;  %v221_v26 = vsel %vm220_vm9, %v206_v12, %v3103_v21 }
 0x139   :  { %995 = vadd.xlane.f32.xlu0 %v994_v17  ;;  %v997_v30 = vadd.f32 %v954_v41, %v953_v43  ;;  %v959_v43 = vmul.f32 %v2577_v57, %v2060_v32  ;;  %v1090_v32 = vmul.f32 %v2577_v57, %v2234_v31 }
 0x13b   :  { %v1103_v42 = vpop.xlane.xlu2 %1102  ;;  %v1100_v23 = vpop.xlane.xlu1 %1099 }
 0x13c   :  { %v1160_v39 = vperm.slane %v1103_v42, %v2303_v50  ;;  %v1159_v4 = vperm.slane %v1100_v23, %v2314_v8  ;;  %v1097_v10 = vpop.xlane.xlu0 %1096  ;;  %v1082_v23 = vmul.f32 %v2382_v6, %v2234_v31 }
 0x13d   :  { %v1157_v47 = vperm.slane %v1097_v10, %v2303_v50  ;;  %v1081_v10 = vmul.f32 %v3097_v51, %v2238_v56  ;;  %v1087_v51 = vmul.f32 %v2480_v60, %v2238_v56  ;;  %v1128_v60 = vadd.f32 %v1085_v59, %v1084_v33 }
 0x13e   :  { %v1161_v49 = vsel %vm599_vm7, %v1160_v39, %v1159_v4  ;;  %v1083_v39 = vmul.f32 %v3102_v15, %v2238_v56  ;;  %v1080_v4 = vmul.f32 %v2350_v20, %v2234_v31  ;;  %v1086_v20 = vmul.f32 %v2475_v18, %v2234_v31 }
 0x13f   :  { %v1158_v35 = vsel %vm599_vm7, %v1157_v47, %v1156_v58  ;;  %v958_v58 = vmul.f32 %v2593_v13, %v3088_v19 }
 0x140   :  { %v2696_v22 = vsel %vm210_vm1, %v1161_v49, %v1158_v35  ;;  %873 = vadd.xlane.f32.xlu2 %v872_v46  ;;  %577 = vadd.xlane.f32.xlu1 %v576_v45  ;;  %v1125_v49 = vadd.f32 %v1083_v39, %v1082_v23  ;;  %v1122_v38 = vadd.f32 %v1081_v10, %v1080_v4 }
 0x141   :  { %574 = vadd.xlane.f32.xlu0 %v573_v11  ;;  %v1003_v6 = vadd.f32 %v958_v58, %v957_v44 }
 0x143   :  { %v2706_v0 = vpop.xlane.xlu2 %298  ;;  %v165_v3 = vpop.xlane.xlu1 %164 }
 0x144   :  { %v208_v17 = vperm.slane %v165_v3, %v2072_v53  ;;  %v162_v28 = vpop.xlane.xlu0 %161  ;;  %v1131_v3 = vadd.f32 %v1087_v51, %v1086_v20  ;;  %v346_v4 = vperm.slane %v2706_v0, %v2104_v9 }
 0x145   :  { %v207_v5 = vperm.slane %v162_v28, %v2065_v24  ;;  %v1088_v28 = vmul.f32 %v2588_v52, %v2234_v31 }
 0x147   :  { %v209_v14 = vsel %vm187_vm0, %v208_v17, %v207_v5 }
 0x148   :  { %v223_v42 = vsel %vm222_vm10, %v209_v14, %v221_v26  ;;  %1001 = vadd.xlane.f32.xlu2 %v1000_v48  ;;  %998 = vadd.xlane.f32.xlu1 %v997_v30  ;;  %v1089_v48 = vmul.f32 %v2593_v13, %v2238_v56 }
 0x149   :  { %226 = vst.msk [vmem:[#allocation2] sm:$0xff] %vm225_vm11, %v223_v42  ;;  %876 = vadd.xlane.f32.xlu0 %v875_v55 }
 0x14b   :  { %v431_v46 = vpop.xlane.xlu2 %430  ;;  %v428_v45 = vpop.xlane.xlu1 %427 }
 0x14c   :  { %v479_v47 = vperm.slane %v431_v46, %v2192_v34  ;;  %v478_v11 = vperm.slane %v428_v45, %v2181_v25  ;;  %v302_v37 = vpop.xlane.xlu0 %301 }
 0x14e   :  { %v480_v15 = vsel %vm464_vm5, %v479_v47, %v478_v11 }
 0x14f   :  { %v2733_v35 = vsel %vm218_vm8, %v480_v15, %v2598_v16  ;;  %v960_v16 = vmul.f32 %v2582_v1, %v3088_v19  ;;  %v1091_v19 = vmul.f32 %v2582_v1, %v2238_v56  ;;  %v1134_v1 = vadd.f32 %v1089_v48, %v1088_v28 }
 0x150   :  { %1004 = vadd.xlane.f32.xlu2 %v1003_v6  ;;  %1126 = vadd.xlane.f32.xlu1 %v1125_v49 }
 0x151   :  { %1123 = vadd.xlane.f32.xlu0 %v1122_v38  ;;  %v1006_v29 = vadd.f32 %v960_v16, %v959_v43  ;;  %v1137_v57 = vadd.f32 %v1091_v19, %v1090_v32 }
 0x153   :  { %v731_v41 = vpop.xlane.xlu2 %730  ;;  %v560_v18 = vpop.xlane.xlu1 %559 }
 0x154   :  { %v611_v2 = vperm.slane %v560_v18, %v2303_v50  ;;  %v557_v27 = vpop.xlane.xlu0 %556  ;;  %v778_v30 = vperm.slane %v731_v41, %v2065_v24 }
 0x155   :  { %v610_v12 = vperm.slane %v557_v27, %v2314_v8 }
 0x157   :  { %v612_v17 = vsel %vm599_vm7, %v611_v2, %v610_v12 }
 0x158   :  { %v2752_v61 = vsel %vm216_vm6, %v612_v17, %v2626_v63  ;;  %1132 = vadd.xlane.f32.xlu2 %v1131_v3  ;;  %1129 = vadd.xlane.f32.xlu1 %v1128_v60 }
 0x159   :  { %1007 = vadd.xlane.f32.xlu0 %v1006_v29 }
 0x15b   :  { %v859_v5 = vpop.xlane.xlu2 %858  ;;  %v856_v63 = vpop.xlane.xlu1 %855 }
 0x15c   :  { %v907_v55 = vperm.slane %v859_v5, %v2097_v36  ;;  %v906_v21 = vperm.slane %v856_v63, %v2104_v9  ;;  %v734_v26 = vpop.xlane.xlu0 %733 }
 0x15d   :  { %v779_v14 = vperm.slane %v734_v26, %v2072_v53 }
 0x15e   :  { %v908_v44 = vsel %vm329_vm3, %v907_v55, %v906_v21  ;;  %v1198_v55 = vld [vmem:[%s3012_s4 + $0x38] sm:$0xff]  ;;  %v1197_v21 = vld [vmem:[%s3012_s4 + $0x30] sm:$0xff] }
 0x15f   :  { %v2769_v31 = vsel %vm216_vm6, %v908_v44, %v2643_v54  ;;  %v780_v56 = vsel %vm187_vm0, %v779_v14, %v778_v30  ;;  %v347_v54 = vperm.slane %v302_v37, %v2097_v36  ;;  %1218 = vmatpush.msra.mxu0 %v1198_v55  ;;  %1488 = vmatpush.msra.mxu2 %v1198_v55 }
 0x160   :  { %v2774_v52 = vsel %vm218_vm8, %v780_v56, %v2652_v40  ;;  %1138 = vadd.xlane.f32.xlu1 %v1137_v57 }
 0x161   :  { %1135 = vadd.xlane.f32.xlu0 %v1134_v1  ;;  %v348_v46 = vsel %vm329_vm3, %v347_v54, %v346_v4  ;;  %1219 = vmatpush.msra.mxu0 %v1197_v21  ;;  %v1195_v4 = vld [vmem:[%s3012_s4 + $0x20] sm:$0xff] }
 0x162   :  { %v357_v37 = vsel %vm220_vm9, %v348_v46, %v2607_v7  ;;  %1489 = vmatpush.msra.mxu2 %v1197_v21 }
 0x163   :  { %v1106_v13 = vpop.xlane.xlu2 %1105  ;;  %v984_v58 = vpop.xlane.xlu1 %983 }
 0x164   :  { %v1035_v42 = vperm.slane %v984_v58, %v2192_v34  ;;  %v981_v23 = vpop.xlane.xlu0 %980  ;;  %v1162_v45 = vperm.slane %v1106_v13, %v2314_v8  ;;  %v1196_v13 = vld [vmem:[%s3012_s4 + $0x28] sm:$0xff] }
 0x165   :  { %v1034_v39 = vperm.slane %v981_v23, %v2181_v25  ;;  %1220 = vmatpush.msra.mxu0 %v1196_v13  ;;  %1490 = vmatpush.msra.mxu2 %v1196_v13 }
 0x167   :  { %v1036_v10 = vsel %vm464_vm5, %v1035_v42, %v1034_v39  ;;  %1221 = vmatpush.msra.mxu0 %v1195_v4  ;;  %1491 = vmatpush.msra.mxu2 %v1195_v4 }
 0x168   :  { %v1051_v40 = vsel %vm214_vm4, %v1036_v10, %v2671_v62  ;;  %v1193_v10 = vld [vmem:[%s3012_s4 + $0x10] sm:$0xff] }
 0x16b   :  { %v308_v47 = vpop.xlane.xlu2 %307  ;;  %v305_v11 = vpop.xlane.xlu1 %304 }
 0x16c   :  { %v350_v6 = vperm.slane %v308_v47, %v2097_v36  ;;  %v349_v49 = vperm.slane %v305_v11, %v2104_v9  ;;  %v1109_v38 = vpop.xlane.xlu0 %1108 }
 0x16d   :  { %v1163_v0 = vperm.slane %v1109_v38, %v2303_v50 }
 0x16e   :  { %v351_v15 = vsel %vm329_vm3, %v350_v6, %v349_v49  ;;  %v1192_v49 = vld [vmem:[%s3012_s4 + $0x8] sm:$0xff] }
 0x16f   :  { %v358_v62 = vsel %vm222_vm10, %v351_v15, %v357_v37  ;;  %v1164_v20 = vsel %vm599_vm7, %v1163_v0, %v1162_v45 }
 0x170   :  { %361 = vst.msk [vmem:[#allocation2] sm:$0xff] %vm360_vm12, %v358_v62  ;;  %v1181_v51 = vsel %vm212_vm2, %v1164_v20, %v2696_v22 }
 0x173   :  { %v2797_v33 = vpop.xlane.xlu2 %562  ;;  %v437_v59 = vpop.xlane.xlu1 %436 }
 0x174   :  { %v434_v43 = vpop.xlane.xlu0 %433  ;;  %v482_v30 = vperm.slane %v437_v59, %v2192_v34  ;;  %v1259_v59 = vld [vmem:[%s3011_s3] sm:$0xff] }
 0x175   :  { %v481_v5 = vperm.slane %v434_v43, %v2181_v25  ;;  %v613_v43 = vperm.slane %v2797_v33, %v2314_v8  ;;  %vm1261_vm14 = vcmp.gt.f32.partialorder %v1259_v59, 0.5 }
 0x177   :  { %v483_v14 = vsel %vm464_vm5, %v482_v30, %v481_v5 }
 0x178   :  { %v492_v58 = vsel %vm220_vm9, %v483_v14, %v2733_v35  ;;  %v1194_v35 = vld [vmem:[%s3012_s4 + $0x18] sm:$0xff] }
 0x179   :  { %1222 = vmatpush.msra.mxu0 %v1194_v35  ;;  %1492 = vmatpush.msra.mxu2 %v1194_v35 }
 0x17b   :  { %v740_v16 = vpop.xlane.xlu2 %739  ;;  %v737_v41 = vpop.xlane.xlu1 %736  ;;  %1223 = vmatpush.msra.mxu0 %v1193_v10  ;;  %1493 = vmatpush.msra.mxu2 %v1193_v10 }
 0x17c   :  { %v2799_v18 = vpop.xlane.xlu0 %565  ;;  %v782_v42 = vperm.slane %v740_v16, %v2072_v53  ;;  %v781_v23 = vperm.slane %v737_v41, %v2065_v24 }
 0x17d   :  { %1224 = vmatpush.msra.mxu0 %v1192_v49  ;;  %1494 = vmatpush.msra.mxu2 %v1192_v49  ;;  %v614_v16 = vperm.slane %v2799_v18, %v2303_v50 }
 0x183   :  { %v987_v7 = vpop.xlane.xlu2 %986  ;;  %v2801_v2 = vpop.xlane.xlu1 %864 }
 0x184   :  { %v2803_v27 = vpop.xlane.xlu0 %861  ;;  %v1037_v3 = vperm.slane %v987_v7, %v2181_v25 }
 0x185   :  { %v909_v30 = vperm.slane %v2803_v27, %v2104_v9 }
 0x18b   :  { %v1115_v60 = vpop.xlane.xlu2 %1114  ;;  %v1112_v12 = vpop.xlane.xlu1 %1111 }
 0x18c   :  { %v1166_v29 = vperm.slane %v1115_v60, %v2303_v50  ;;  %v1165_v22 = vperm.slane %v1112_v12, %v2314_v8  ;;  %v990_v17 = vpop.xlane.xlu0 %989  ;;  %v615_v12 = vsel %vm599_vm7, %v614_v16, %v613_v43 }
 0x18d   :  { %v1038_v32 = vperm.slane %v990_v17, %v2192_v34 }
 0x18e   :  { %v1167_v19 = vsel %vm599_vm7, %v1166_v29, %v1165_v22 }
 0x18f   :  { %v2811_v28 = vsel %vm214_vm4, %v1167_v19, %v1181_v51  ;;  %v1039_v48 = vsel %vm464_vm5, %v1038_v32, %v1037_v3  ;;  %v1545_v3 = vmov 0   ;;  %v626_v19 = vsel %vm218_vm8, %v615_v12, %v2752_v61 }
 0x190   :  { %v2817_v63 = vsel %vm216_vm6, %v1039_v48, %v1051_v40  ;;  %v783_v40 = vsel %vm187_vm0, %v782_v42, %v781_v23  ;;  %1501 = vset.pattern.permute.xlu0 %v1545_v3  ;;  %v1263_v60 = vsel %vm1261_vm14, 1, %v1545_v3  ;;  %1500 = vset.pattern.permute.xlu2 %v1545_v3  ;;  %v910_v48 = vperm.slane %v2801_v2, %v2097_v36 }
 0x191   :  { %v792_v38 = vsel %vm220_vm9, %v783_v40, %v2774_v52  ;;  %1266 = vperm.xlu0 %1501, %v1263_v60   ;;  %1502 = vset.pattern.permute.xlu1 %v1545_v3 }
 0x192   :  { %v911_v61 = vsel %vm329_vm3, %v910_v48, %v909_v30  ;;  %v1503_v48 = vld [vmem:[%s3014_s6] ss:$0 sm:$0xff] }
 0x193   :  { %v2825_v26 = vpop.xlane.xlu2 %568  ;;  %v443_v57 = vpop.xlane.xlu1 %442  ;;  %v922_v13 = vsel %vm218_vm8, %v911_v61, %v2769_v31  ;;  %v1260_v31 = vld [vmem:[%s3011_s3 + $0x8] sm:$0xff] }
 0x194   :  { %v485_v1 = vperm.slane %v443_v57, %v2192_v34  ;;  %v440_v44 = vpop.xlane.xlu0 %439  ;;  %v616_v41 = vperm.slane %v2825_v26, %v2314_v8  ;;  %vm1262_vm1 = vcmp.gt.f32.partialorder %v1260_v31, 0.5 }
 0x195   :  { %v484_v56 = vperm.slane %v440_v44, %v2181_v25 }
 0x197   :  { %v486_v39 = vsel %vm464_vm5, %v485_v1, %v484_v56 }
 0x198   :  { %v493_v54 = vsel %vm222_vm10, %v486_v39, %v492_v58 }
 0x199   :  { %496 = vst.msk [vmem:[#allocation2] sm:$0xff] %vm495_vm13, %v493_v54 }
 0x19b   :  { %v746_v46 = vpop.xlane.xlu2 %745  ;;  %v743_v45 = vpop.xlane.xlu1 %742 }
 0x19c   :  { %v785_v47 = vperm.slane %v746_v46, %v2072_v53  ;;  %v784_v11 = vperm.slane %v743_v45, %v2065_v24  ;;  %v572_v6 = vpop.xlane.xlu0 %571  ;;  %v1191_v24 = vld [vmem:[%s3012_s4] sm:$0xff]  ;;  %v1264_v46 = vsel %vm1262_vm1, 1, %v1545_v3 }
 0x19d   :  { %1225 = vmatpush.msra.mxu0 %v1191_v24  ;;  %1495 = vmatpush.msra.mxu2 %v1191_v24  ;;  %v617_v7 = vperm.slane %v572_v6, %v2303_v50 }
 0x19e   :  { %v786_v0 = vsel %vm187_vm0, %v785_v47, %v784_v11  ;;  %vm1203_vm0 = vcmask 523264  }
 0x19f   :  { %v793_v37 = vsel %vm222_vm10, %v786_v0, %v792_v38  ;;  %v618_v33 = vsel %vm599_vm7, %v617_v7, %v616_v41 }
 0x1a0   :  { %795 = vst.msk [vmem:[#allocation2 + $0x8] sm:$0xff] %vm225_vm11, %v793_v37  ;;  %v627_v5 = vsel %vm220_vm9, %v618_v33, %v626_v19  ;;  %v1284_v19 = vld [vmem:[%s3016_s8] sm:$0xff] }
 0x1a3   :  { %v2863_v53 = vpop.xlane.xlu2 %992  ;;  %v871_v15 = vpop.xlane.xlu1 %870 }
 0x1a4   :  { %v868_v62 = vpop.xlane.xlu0 %867  ;;  %v913_v21 = vperm.slane %v871_v15, %v2097_v36  ;;  %v1040_v10 = vperm.slane %v2863_v53, %v2181_v25 }
 0x1a5   :  { %v912_v26 = vperm.slane %v868_v62, %v2104_v9 }
 0x1a7   :  { %v914_v27 = vsel %vm329_vm3, %v913_v21, %v912_v26 }
 0x1a8   :  { %v923_v58 = vsel %vm220_vm9, %v914_v27, %v922_v13 }
 0x1ab   :  { %v2865_v20 = vpop.xlane.xlu2 %1120  ;;  %v2867_v52 = vpop.xlane.xlu1 %1117 }
 0x1ac   :  { %v996_v51 = vpop.xlane.xlu0 %995  ;;  %v1169_v53 = vperm.slane %v2865_v20, %v2303_v50  ;;  %v1168_v15 = vperm.slane %v2867_v52, %v2314_v8 }
 0x1ad   :  { %v1041_v40 = vperm.slane %v996_v51, %v2192_v34 }
 0x1ae   :  { %v1170_v52 = vsel %vm599_vm7, %v1169_v53, %v1168_v15 }
 0x1af   :  { %v1042_v11 = vsel %vm464_vm5, %v1041_v40, %v1040_v10  ;;  %v1183_v12 = vsel %vm216_vm6, %v1170_v52, %v2811_v28  ;;  %v1285_v28 = vld [vmem:[%s3016_s8 + $0x8] sm:$0xff] }
 0x1b0   :  { %v1053_v62 = vsel %vm218_vm8, %v1042_v11, %v2817_v63 }
 0x1b3   :  { %v874_v29 = vpop.xlane.xlu2 %873  ;;  %v578_v22 = vpop.xlane.xlu1 %577 }
 0x1b4   :  { %v620_v18 = vperm.slane %v578_v22, %v2303_v50  ;;  %v575_v17 = vpop.xlane.xlu0 %574  ;;  %v915_v14 = vperm.slane %v874_v29, %v2104_v9  ;;  %v1233_v9 = vld [vmem:[%s3010_s2] sm:$0xff] }
 0x1b5   :  { %v619_v32 = vperm.slane %v575_v17, %v2314_v8  ;;  %1238 = vperm.xlu2 %1500, %v1233_v9  }
 0x1b7   :  { %v621_v55 = vsel %vm599_vm7, %v620_v18, %v619_v32 }
 0x1b8   :  { %v628_v57 = vsel %vm222_vm10, %v621_v55, %v627_v5  ;;  %v1504_v5 = vld [vmem:[%s3013_s5] ss:$0 sm:$0xff] }
 0x1b9   :  { %631 = vst.msk [vmem:[#allocation2] sm:$0xff] %vm630_vm15, %v628_v57  ;;  %v1505_v57 = vld [vmem:[%s3015_s7] ss:$0 sm:$0xff]  ;;  %s1546_s7 = smov [#allocation3]  }
 0x1bb   :  { %v1002_v2 = vpop.xlane.xlu2 %1001  ;;  %v999_v1 = vpop.xlane.xlu1 %998 }
 0x1bc   :  { %v877_v44 = vpop.xlane.xlu0 %876  ;;  %v1044_v45 = vperm.slane %v1002_v2, %v2192_v34  ;;  %v1043_v47 = vperm.slane %v999_v1, %v2181_v25 }
 0x1bd   :  { %v916_v56 = vperm.slane %v877_v44, %v2097_v36  ;;  %v1234_v36 = vld [vmem:[%s3010_s2 + $0x8] sm:$0xff]  ;;  %1269 = vperm.xlu2 %1500, %v1264_v46  }
 0x1be   :  { %1243 = vperm.xlu1 %1502, %v1234_v36   ;;  %v1045_v38 = vsel %vm464_vm5, %v1044_v45, %v1043_v47 }
 0x1bf   :  { %v917_v42 = vsel %vm329_vm3, %v916_v56, %v915_v14  ;;  %v1054_v51 = vsel %vm220_vm9, %v1045_v38, %v1053_v62  ;;  %vm1277_vm3 = vcmask 261120  }
 0x1c0   :  { %v924_v23 = vsel %vm222_vm10, %v917_v42, %v923_v58  ;;  %v1189_v39 = vld [vmem:[#allocation2] sm:$0xff] }
 0x1c1   :  { %926 = vst.msk [vmem:[#allocation2 + $0x8] sm:$0xff] %vm360_vm12, %v924_v23  ;;  %1484 = vmatmul.msk.f32.vlgmr.msra.gmra.mxu0 %vm1203_vm0, %v1189_v39 }
 0x1c3   :  { %v1005_v4 = vpop.xlane.xlu2 %1004  ;;  %v1127_v54 = vpop.xlane.xlu1 %1126 }
 0x1c4   :  { %v1124_v35 = vpop.xlane.xlu0 %1123  ;;  %v1046_v6 = vperm.slane %v1005_v4, %v2181_v25  ;;  %v1172_v25 = vperm.slane %v1127_v54, %v2303_v50  ;;  %v1506_v54 = vld [vmem:[%s3017_s9] ss:$0 sm:$0xff] }
 0x1c5   :  { %v1171_v59 = vperm.slane %v1124_v35, %v2314_v8 }
 0x1c7   :  { %v1173_v63 = vsel %vm599_vm7, %v1172_v25, %v1171_v59 }
 0x1c8   :  { %v1184_v22 = vsel %vm218_vm8, %v1173_v63, %v1183_v12 }
 0x1cb   :  { %v1130_v49 = vpop.xlane.xlu1 %1129  ;;  %v1133_v37 = vpop.xlane.xlu2 %1132 }
 0x1cc   :  { %v1008_v0 = vpop.xlane.xlu0 %1007  ;;  %v1175_v16 = vperm.slane %v1133_v37, %v2303_v50 }
 0x1cd   :  { %v1047_v24 = vperm.slane %v1008_v0, %v2192_v34  ;;  %v1174_v34 = vperm.slane %v1130_v49, %v2314_v8 }
 0x1cf   :  { %v1048_v43 = vsel %vm464_vm5, %v1047_v24, %v1046_v6  ;;  %v1176_v7 = vsel %vm599_vm7, %v1175_v16, %v1174_v34 }
 0x1d0   :  { %v1055_v20 = vsel %vm222_vm10, %v1048_v43, %v1054_v51  ;;  %v1185_v33 = vsel %vm220_vm9, %v1176_v7, %v1184_v22 }
 0x1d1   :  { %1057 = vst.msk [vmem:[#allocation2 + $0x8] sm:$0xff] %vm495_vm13, %v1055_v20 }
 0x1d3   :  { %v1139_v41 = vpop.xlane.xlu1 %1138 }
 0x1d4   :  { %v1178_v3 = vperm.slane %v1139_v41, %v2303_v50  ;;  %v1136_v60 = vpop.xlane.xlu0 %1135  ;;  %v1287_v50 = vld [vmem:[%s3016_s8 + $0x18] sm:$0xff] }
 0x1d5   :  { %v1177_v29 = vperm.slane %v1136_v60, %v2314_v8  ;;  %1306 = vmatpush.msra.mxu1 %v1287_v50  ;;  %v1286_v8 = vld [vmem:[%s3016_s8 + $0x10] sm:$0xff]  ;;  %s1430_s8 = sshll.u32 %s1546_s7, 4  ;;  %s1431_s8 = int_to_ptr.vmem [resolvable:$true] %s1430_s8 }
 0x1d7   :  { %v1179_v18 = vsel %vm599_vm7, %v1178_v3, %v1177_v29  ;;  %1307 = vmatpush.msra.mxu1 %v1286_v8 }
 0x1d8   :  { %v1186_v17 = vsel %vm222_vm10, %v1179_v18, %v1185_v33  ;;  %vm1383_vm10 = vcmask 31744  }
 0x1d9   :  { %1188 = vst.msk [vmem:[#allocation2 + $0x8] sm:$0xff] %vm630_vm15, %v1186_v17  ;;  %1308 = vmatpush.msra.mxu1 %v1285_v28 }
 0x1db   :  { %1309 = vmatpush.msra.mxu1 %v1284_v19 }
 0x1e0   :  { %v1190_v32 = vld [vmem:[#allocation2 + $0x8] sm:$0xff] }
 0x1e1   :  { %1485 = vmatmul.msk.f32.vlgmr.msra.gmra.mxu2 %vm1203_vm0, %v1190_v32 }
 0x203   :  { %v2972_v61 = vpop.permute.xlu0 %1266 }
 0x204   :  { %vm1271_vm2 = vcmp.eq.s32.totalorder %v2972_v61, 1 }
 0x20f   :  { %v1239_v30 = vpop.permute.xlu2 %1238 }
 0x210   :  { %v1249_v55 = vmul.f32 %v1503_v48, %v1239_v30 }
 0x217   :  { %v2980_v23 = vpop.permute.xlu2 %1269 }
 0x218   :  { %vm1272_vm4 = vcmp.eq.s32.totalorder %v2980_v23, 1 }
 0x230   :  { %v1244_v56 = vpop.permute.xlu1 %1243 }
 0x231   :  { %v1250_v13 = vmul.f32 %v1503_v48, %v1244_v56 }
 0x23e   :  { %v1227_v21 = vpop.f32.mrf.mxu0 }
 0x23f   :  { %v1228_v26 = vadd.f32 %v1504_v5, %v1227_v21 }
 0x241   :  { %v1251_v14 = vadd.f32 %v1249_v55, %v1228_v26 }
 0x243   :  { %v1257_v2 = vadd.f32 %v1505_v57, %v1251_v14 }
 0x245   :  { %v1273_v1 = vsel %vm1271_vm2, %v1257_v2, 0.0 }
 0x246   :  { %1420 = vst.msk [vmem:[#allocation3] sm:$0xff] %vm1277_vm3, %v1273_v1  ;;  %1486 = vmatmul.msk.f32.vlgmr.msra.gmra.mxu1 %vm1277_vm3, %v1273_v1  ;;  %v1275_v27 = vmul.f32 %v1273_v1, %v1273_v1 }
 0x248   :  { %v1278_v44 = vsel %vm1277_vm3, %v1275_v27, 0.0 }
 0x249   :  { %1279 = vadd.xlane.f32.xlu2 %v1278_v44 }
 0x264   :  { %v1230_v58 = vpop.f32.mrf.mxu2 }
 0x265   :  { %v1231_v42 = vadd.f32 %v1504_v5, %v1230_v58 }
 0x267   :  { %v1252_v39 = vadd.f32 %v1250_v13, %v1231_v42 }
 0x269   :  { %v1258_v9 = vadd.f32 %v1505_v57, %v1252_v39 }
 0x26b   :  { %v1274_v36 = vsel %vm1272_vm4, %v1258_v9, 0.0 }
 0x26c   :  { %1487 = vmatmul.msk.f32.gmra.mxu1 %vm1277_vm3, %v1274_v36  ;;  %1421 = vst.msk [vmem:[#allocation3 + $0x8] sm:$0xff] %vm1277_vm3, %v1274_v36  ;;  %v1276_v31 = vmul.f32 %v1274_v36, %v1274_v36 }
 0x26d   :  { %1438 = dma.vmem_to_hbm [thread:$0]  %s1431_s8, 256, %s1433_s12, [#allocation4], %s1547_s13, %s1547_s13, %s1548_s14  }
 0x26e   :  { %v1281_v4 = vsel %vm1277_vm3, %v1276_v31, 0.0 }
 0x26f   :  { %1282 = vadd.xlane.f32.xlu1 %v1281_v4 }
 0x2bc   :  { %v1280_v35 = vpop.xlane.xlu2 %1279 }
 0x2bd   :  { %v1321_v40 = vadd.f32 %v1506_v54, %v1280_v35 }
 0x2c3   :  { %v1311_v10 = vpop.f32.mrf.mxu1 }
 0x2c4   :  { %v1323_v46 = vmul.f32 2.0, %v1311_v10 }
 0x2c6   :  { %v1325_v45 = vsub.f32 %v1321_v40, %v1323_v46 }
 0x2c8   :  { %v1327_v47 = vmax.f32 %v1325_v45, 0.0 }
 0x2ca   :  { %1507 = vrsqrt.f32 %v1327_v47  ;;  %vm1336_vm5 = vcmp.eq.f32.partialorder %v1327_v47, inf  ;;  %v1339_v53 = vand.u32 2147483648, %v1327_v47  ;;  %vm1338_vm6 = vcmp.eq.f32.partialorder %v1327_v47, 0.0 }
 0x2d0   :  { %v1508_v11 = vpop.eup %1507 }
 0x2d1   :  { %v1330_v6 = vmul.f32 %v1508_v11, %v1327_v47 }
 0x2d3   :  { %v1331_v49 = vmul.f32 %v1508_v11, %v1330_v6 }
 0x2d5   :  { %v1332_v38 = vmul.f32 0.5, %v1331_v49 }
 0x2d7   :  { %v1333_v0 = vsub.f32 1.5, %v1332_v38 }
 0x2d9   :  { %v1334_v37 = vmul.f32 %v1508_v11, %v1333_v0 }
 0x2db   :  { %v1335_v24 = vmul.f32 %v1334_v37, %v1327_v47 }
 0x2dd   :  { %v1337_v15 = vsel %vm1336_vm5, %v1327_v47, %v1335_v24 }
 0x2de   :  { %v1340_v62 = vsel %vm1338_vm6, %v1339_v53, %v1337_v15 }
 0x2df   :  { %v1353_v51 = vadd.f32 1.0, %v1340_v62 }
 0x2e1   :  { %1509 = vrcp.f32 %v1353_v51  ;;  %v1366_v63 = vand.u32 2147483648, %v1353_v51  ;;  %v1364_v3 = vand.u32 2147483647, %v1353_v51  ;;  %vm1360_vm8 = vweird.f32 %v1353_v51 }
 0x2e2   :  { %v1283_v59 = vpop.xlane.xlu1 %1282 }
 0x2e3   :  { %v1322_v34 = vadd.f32 %v1506_v54, %v1283_v59  ;;  %v1367_v29 = vor.u32 1.1754944e-38, %v1366_v63  ;;  %vm1365_vm11 = vcmp.eq.f32.partialorder %v1364_v3, 8.507059e+37 }
 0x2e7   :  { %v1510_v25 = vpop.eup %1509 }
 0x2e8   :  { %v1356_v43 = vmul.f32 %v1510_v25, %v1353_v51  ;;  %vm1361_vm7 = vweird.f32 %v1510_v25 }
 0x2e9   :  { %v1314_v16 = vpop.f32.mrf.mxu1  ;;  %vm1362_vm9 = vmor %vm1360_vm8, %vm1361_vm7 }
 0x2ea   :  { %v1324_v20 = vmul.f32 2.0, %v1314_v16  ;;  %v1357_v52 = vsub.f32 1.0, %v1356_v43 }
 0x2ec   :  { %v1326_v41 = vsub.f32 %v1322_v34, %v1324_v20  ;;  %v1358_v7 = vmul.f32 %v1510_v25, %v1357_v52 }
 0x2ee   :  { %v1328_v60 = vmax.f32 %v1326_v41, 0.0  ;;  %v1359_v12 = vadd.f32 %v1510_v25, %v1358_v7 }
 0x2f0   :  { %1511 = vrsqrt.f32 %v1328_v60  ;;  %v1363_v22 = vsel %vm1362_vm9, %v1510_v25, %v1359_v12  ;;  %vm1348_vm12 = vcmp.eq.f32.partialorder %v1328_v60, inf  ;;  %v1351_v30 = vand.u32 2147483648, %v1328_v60 }
 0x2f1   :  { %v1368_v33 = vsel %vm1365_vm11, %v1367_v29, %v1363_v22  ;;  %vm1350_vm13 = vcmp.eq.f32.partialorder %v1328_v60, 0.0 }
 0x2f2   :  { %v1384_v18 = vsel %vm1383_vm10, %v1368_v33, 0.0 }
 0x2f3   :  { %1385 = vadd.xlane.f32.xlu0 %v1384_v18 }
 0x2f6   :  { %v1512_v17 = vpop.eup %1511 }
 0x2f7   :  { %v1342_v32 = vmul.f32 %v1512_v17, %v1328_v60 }
 0x2f9   :  { %v1343_v50 = vmul.f32 %v1512_v17, %v1342_v32 }
 0x2fb   :  { %v1344_v8 = vmul.f32 0.5, %v1343_v50 }
 0x2fd   :  { %v1345_v28 = vsub.f32 1.5, %v1344_v8 }
 0x2ff   :  { %v1346_v19 = vmul.f32 %v1512_v17, %v1345_v28 }
 0x301   :  { %v1347_v48 = vmul.f32 %v1346_v19, %v1328_v60 }
 0x303   :  { %v1349_v5 = vsel %vm1348_vm12, %v1328_v60, %v1347_v48 }
 0x304   :  { %v1352_v55 = vsel %vm1350_vm13, %v1351_v30, %v1349_v5 }
 0x305   :  { %v1354_v21 = vadd.f32 1.0, %v1352_v55 }
 0x307   :  { %1513 = vrcp.f32 %v1354_v21  ;;  %v1380_v2 = vand.u32 2147483648, %v1354_v21  ;;  %v1378_v27 = vand.u32 2147483647, %v1354_v21  ;;  %vm1374_vm15 = vweird.f32 %v1354_v21 }
 0x309   :  { %v1381_v56 = vor.u32 1.1754944e-38, %v1380_v2  ;;  %vm1379_vm1 = vcmp.eq.f32.partialorder %v1378_v27, 8.507059e+37 }
 0x30d   :  { %v1514_v26 = vpop.eup %1513 }
 0x30e   :  { %v1370_v57 = vmul.f32 %v1514_v26, %v1354_v21  ;;  %vm1375_vm14 = vweird.f32 %v1514_v26 }
 0x30f   :  { %vm1376_vm0 = vmor %vm1374_vm15, %vm1375_vm14 }
 0x310   :  { %v1371_v14 = vsub.f32 1.0, %v1370_v57 }
 0x312   :  { %v1372_v1 = vmul.f32 %v1514_v26, %v1371_v14 }
 0x314   :  { %v1373_v44 = vadd.f32 %v1514_v26, %v1372_v1 }
 0x316   :  { %v1377_v13 = vsel %vm1376_vm0, %v1514_v26, %v1373_v44 }
 0x317   :  { %v1382_v58 = vsel %vm1379_vm1, %v1381_v56, %v1377_v13 }
 0x318   :  { %v1387_v42 = vsel %vm1383_vm10, %v1382_v58, 0.0 }
 0x319   :  { %1388 = vadd.xlane.f32.xlu2 %v1387_v42 }
 0x366   :  { %v1386_v39 = vpop.xlane.xlu0 %1385 }
 0x367   :  { %1515 = vrcp.f32 %v1386_v39  ;;  %v1401_v4 = vand.u32 2147483648, %v1386_v39  ;;  %v1399_v35 = vand.u32 2147483647, %v1386_v39  ;;  %vm1395_vm5 = vweird.f32 %v1386_v39 }
 0x369   :  { %v1402_v40 = vor.u32 1.1754944e-38, %v1401_v4  ;;  %vm1400_vm7 = vcmp.eq.f32.partialorder %v1399_v35, 8.507059e+37 }
 0x36d   :  { %v1516_v9 = vpop.eup %1515 }
 0x36e   :  { %v1391_v36 = vmul.f32 %v1516_v9, %v1386_v39  ;;  %vm1396_vm3 = vweird.f32 %v1516_v9 }
 0x36f   :  { %vm1397_vm6 = vmor %vm1395_vm5, %vm1396_vm3 }
 0x370   :  { %v1392_v31 = vsub.f32 1.0, %v1391_v36 }
 0x372   :  { %v1393_v54 = vmul.f32 %v1516_v9, %v1392_v31 }
 0x374   :  { %v1394_v10 = vadd.f32 %v1516_v9, %v1393_v54 }
 0x376   :  { %v1398_v46 = vsel %vm1397_vm6, %v1516_v9, %v1394_v10 }
 0x377   :  { %v1403_v45 = vsel %vm1400_vm7, %v1402_v40, %v1398_v46 }
 0x378   :  { %v1418_v47 = vmul.f32 %v1403_v45, %v1368_v33 }
 0x37a   :  { %v1422_v11 = vsel %vm1271_vm2, %v1418_v47, 0.0 }
 0x37b   :  { %1424 = vst.msk [vmem:[%s3019_s11] sm:$0xff] %vm1383_vm10, %v1422_v11 }
 0x38c   :  { %v1389_v6 = vpop.xlane.xlu2 %1388 }
 0x38d   :  { %1517 = vrcp.f32 %v1389_v6  ;;  %v1415_v37 = vand.u32 2147483648, %v1389_v6  ;;  %v1413_v53 = vand.u32 2147483647, %v1389_v6  ;;  %vm1409_vm9 = vweird.f32 %v1389_v6 }
 0x38f   :  { %v1416_v62 = vor.u32 1.1754944e-38, %v1415_v37  ;;  %vm1414_vm2 = vcmp.eq.f32.partialorder %v1413_v53, 8.507059e+37 }
 0x393   :  { %v1518_v49 = vpop.eup %1517 }
 0x394   :  { %v1405_v38 = vmul.f32 %v1518_v49, %v1389_v6  ;;  %vm1410_vm8 = vweird.f32 %v1518_v49 }
 0x395   :  { %vm1411_vm11 = vmor %vm1409_vm9, %vm1410_vm8 }
 0x396   :  { %v1406_v0 = vsub.f32 1.0, %v1405_v38 }
 0x398   :  { %v1407_v24 = vmul.f32 %v1518_v49, %v1406_v0 }
 0x39a   :  { %v1408_v15 = vadd.f32 %v1518_v49, %v1407_v24 }
 0x39c   :  { %v1412_v61 = vsel %vm1411_vm11, %v1518_v49, %v1408_v15 }
 0x39d   :  { %v1417_v51 = vsel %vm1414_vm2, %v1416_v62, %v1412_v61 }
 0x39e   :  { %v1419_v25 = vmul.f32 %v1417_v51, %v1382_v58 }
 0x3a0   :  { %v1423_v59 = vsel %vm1272_vm4, %v1419_v25, 0.0 }
 0x3a1   :  { %1425 = vst.msk [vmem:[%s3019_s11 + $0x8] sm:$0xff] %vm1383_vm10, %v1423_v59 }
 0x3a2   :  { %1543 = dma.done.wait [#allocation4], 256  }
 0x3a3   :  { %1544 = vsyncadd [#allocation4], 4294967040 }
 0x3a4   :  { %1447 = vsyncpa [#allocation4], 1 }

</bundles_post_ra>
